<compile_context>
chip_gen: v6e
topology: v6e:2x2x1
jax: 0.10.0
libtpu: 0.0.40
codegen_flags: <defaults>
</compile_context>

<pallas_src>
import jax
import jax.numpy as jnp
from jax import lax
from jax.experimental import pallas as pl
from jax.experimental.pallas import tpu as pltpu

N, C, H, W = 2, 4, 16, 16
C2 = 2 * C                          # 8: full sublane height
HP, WP = H + 2, W + 2               # zero-padded spatial dims (3x3 conv, pad=1)
L = N * HP * WP                     # 648: flattened padded spatial length
NHW = N * H * W                     # 512: real pixels per channel
Lp = 768                            # lane-padded working length (6 * 128)
ML = 128                            # left margin (tile-aligned interior)
LW = 1024                           # ML + Lp + 128 right margin (>= tap shift 19)
EPS = 1e-5


def _conv3x3_dup(dupA_ref, dupB_ref, wp_all, conv_idx):
    """3x3 conv as 18 full-(8,Lp) FMAs from duplicated-channel sources.

    dupA rows = [c0,c0,c0,c0, c2,c2,c2,c2], dupB rows = [c1 x4, c3 x4].
    Weight column (8,1) carries w[co, ci_top] in rows 0-3 and w[co, ci_bot] in
    rows 4-7, so one multiply applies two input channels at once.
    """
    dy_accs = []
    for dy in range(3):
        acc = None
        for dx in range(3):
            t = dy * 3 + dx
            s = (dy - 1) * WP + (dx - 1)            # flat tap shift
            c0 = ML + s                              # static lane offset
            jA = conv_idx * 18 + t * 2
            termA = wp_all[:, jA:jA + 1] * dupA_ref[:, c0:c0 + Lp]
            termB = wp_all[:, jA + 1:jA + 2] * dupB_ref[:, c0:c0 + Lp]
            contrib = termA + termB
            acc = contrib if acc is None else acc + contrib
        dy_accs.append(acc)                          # 3 independent chains
    acc8 = dy_accs[0] + dy_accs[1] + dy_accs[2]      # (8, Lp)
    # Fold the two sublane halves: rows 0-3 <- rows 0-3 + rows 4-7.
    folded = acc8 + pltpu.roll(acc8, shift=C, axis=0)
    return folded[0:C, :]                            # (C, Lp)


def residual_block_kernel(act_ref, wp_ref, out_ref, dupA_ref, dupB_ref):
    # act_ref : (8, LW)  rows 0-3: zero-padded input (padded-flat, zero margins)
    #                    rows 4-7: interior mask replicated C times
    # wp_ref  : (8, 42)  cols 0-35: paired conv weights (conv*18 + tap*2 + pair)
    #                    cols 36-41 rows 0-3: [b1, g1, beta1, b2, g2, beta2]
    # out_ref : (C, Lp)  padded-flat output (wrapper slices the interior)
    # dupA/B  : (8, LW)  duplicated-channel conv sources (scratch)
    wp_all = wp_ref[...]                             # single (8,128) vreg tile
    mask = act_ref[C:C2, ML:ML + Lp]                 # (C, Lp) ready-made mask
    x_res = act_ref[0:C, ML:ML + Lp]                 # (C, Lp) residual

    # One-time duplicated-channel sources for conv1 (full width, so the zero
    # margins of the packed input propagate into the scratch margins).
    # (These 8 copies could equally be stride-0 sublane-broadcast ref loads.)
    dupA_ref[0:C, :] = jnp.broadcast_to(act_ref[0:1, :], (C, LW))
    dupA_ref[C:C2, :] = jnp.broadcast_to(act_ref[2:3, :], (C, LW))
    dupB_ref[0:C, :] = jnp.broadcast_to(act_ref[1:2, :], (C, LW))
    dupB_ref[C:C2, :] = jnp.broadcast_to(act_ref[3:4, :], (C, LW))

    inv_n = 1.0 / float(NHW)

    def bn_train(y, gamma_col, beta_col):
        # Training-mode BN over the NHW interior pixels, single statistics
        # pass (var = E[y^2] - mean^2), folded to one scale/shift.
        ym = y * mask
        s1 = jnp.sum(ym, axis=1, keepdims=True)          # (C, 1)
        s2 = jnp.sum(ym * ym, axis=1, keepdims=True)     # (C, 1)
        mean = s1 * inv_n
        var = s2 * inv_n - mean * mean
        scale = gamma_col * lax.rsqrt(var + EPS)
        shift = beta_col - mean * scale
        return ym * scale + shift

    pcol = lambda k: wp_all[0:C, 36 + k:37 + k]          # (C, 1) BN params

    # conv1 -> bn1 -> relu (mask re-zeroes the halo so it acts as conv2 padding)
    h1 = _conv3x3_dup(dupA_ref, dupB_ref, wp_all, 0) + pcol(0)
    h1 = jnp.maximum(bn_train(h1, pcol(1), pcol(2)), 0.0) * mask

    # Duplicated-channel sources for conv2: overwrite the interior only; the
    # margins keep the zeros written above (no zero-fill, no store round trip).
    dupA_ref[0:C, ML:ML + Lp] = jnp.broadcast_to(h1[0:1, :], (C, Lp))
    dupA_ref[C:C2, ML:ML + Lp] = jnp.broadcast_to(h1[2:3, :], (C, Lp))
    dupB_ref[0:C, ML:ML + Lp] = jnp.broadcast_to(h1[1:2, :], (C, Lp))
    dupB_ref[C:C2, ML:ML + Lp] = jnp.broadcast_to(h1[3:4, :], (C, Lp))

    # conv2 -> bn2 -> +residual -> relu  (lane-dense (C, 768) store)
    h2 = _conv3x3_dup(dupA_ref, dupB_ref, wp_all, 1) + pcol(3)
    h2 = bn_train(h2, pcol(4), pcol(5))
    out_ref[...] = jnp.maximum(h2 + x_res, 0.0)


def _pack_paired_weights(w):
    # (O, I, 3, 3) -> (8, 18): row = half*C + co  (half 0: ci in {0,1}, half 1:
    # ci in {2,3}), column = tap*2 + pair, value = w[co, ci(pair, half), tap].
    w_r = w.reshape(C, C, 9)
    halves = jnp.stack([w_r[:, (0, 1), :], w_r[:, (2, 3), :]], axis=0)  # (2,C,2,9)
    return jnp.transpose(halves.reshape(C2, 2, 9), (0, 2, 1)).reshape(C2, 18)


@jax.jit
def residual_block_pallas(x_nchw, params):
    w1, b1, g1, bt1, w2, b2, g2, bt2 = params

    # NCHW -> lane-dense padded-flat (C, L) with left/right margins.
    xp = jnp.pad(x_nchw, ((0, 0), (0, 0), (1, 1), (1, 1)))          # (N,C,HP,WP)
    xf = jnp.transpose(xp, (1, 0, 2, 3)).reshape(C, L)
    x_ext = jnp.pad(xf, ((0, 0), (ML, LW - ML - L)))                # (C, LW)

    # Interior mask, replicated C times (fills all 8 sublanes of the DMA).
    m = jnp.zeros((N, HP, WP), jnp.float32).at[:, 1:H + 1, 1:W + 1].set(1.0)
    m_ext = jnp.pad(jnp.broadcast_to(m.reshape(1, L), (C, L)),
                    ((0, 0), (ML, LW - ML - L)))                    # (C, LW)
    act = jnp.concatenate([x_ext, m_ext], axis=0).astype(jnp.float32)  # (8, LW)

    # Paired conv weights + BN params packed into a single (8, 42) vreg tile.
    wq = jnp.concatenate([_pack_paired_weights(w1.astype(jnp.float32)),
                          _pack_paired_weights(w2.astype(jnp.float32))], axis=1)
    pc = jnp.stack([b1, g1, bt1, b2, g2, bt2], axis=1).astype(jnp.float32)
    pc8 = jnp.concatenate([pc, jnp.zeros((C, 6), jnp.float32)], axis=0)
    wp = jnp.concatenate([wq, pc8], axis=1)                         # (8, 42)

    vmem = pl.BlockSpec(memory_space=pltpu.MemorySpace.VMEM)
    out_flat = pl.pallas_call(
        residual_block_kernel,
        out_shape=jax.ShapeDtypeStruct((C, Lp), jnp.float32),
        in_specs=[vmem, vmem],
        out_specs=vmem,
        scratch_shapes=[pltpu.VMEM((C2, LW), jnp.float32),
                        pltpu.VMEM((C2, LW), jnp.float32)],
        cost_estimate=pl.CostEstimate(flops=330_000, transcendentals=8,
                                      bytes_accessed=60_000),
    )(act, wp)

    # Un-flatten: (C, Lp) -> first L lanes -> (C, N, HP, WP) -> interior -> NCHW.
    out = out_flat[:, :L].reshape(C, N, HP, WP)[:, :, 1:H + 1, 1:W + 1]
    return jnp.transpose(out, (1, 0, 2, 3))


def residual_block_reference(x, params):
    w1, b1, g1, bt1, w2, b2, g2, bt2 = params

    def conv(h, w, b):
        y = lax.conv_general_dilated(
            h, w, window_strides=(1, 1), padding=((1, 1), (1, 1)),
            dimension_numbers=("NCHW", "OIHW", "NCHW"))
        return y + b.reshape(1, C, 1, 1)

    def bn(y, g, bt):
        mean = y.mean(axis=(0, 2, 3), keepdims=True)
        var = ((y - mean) ** 2).mean(axis=(0, 2, 3), keepdims=True)
        return (y - mean) / jnp.sqrt(var + EPS) * g.reshape(1, C, 1, 1) \
            + bt.reshape(1, C, 1, 1)

    h = jax.nn.relu(bn(conv(x, w1, b1), g1, bt1))
    h = bn(conv(h, w2, b2), g2, bt2)
    return jax.nn.relu(h + x)


if __name__ == "__main__":
    key = jax.random.PRNGKey(0)
    keys = jax.random.split(key, 9)

    # Deterministic synthetic parameters (shapes from nn.Conv2d / nn.BatchNorm2d)
    w1 = jax.random.normal(keys[0], (C, C, 3, 3), jnp.float32) * 0.2
    b1 = jax.random.normal(keys[1], (C,), jnp.float32) * 0.1
    g1 = 1.0 + 0.1 * jax.random.normal(keys[2], (C,), jnp.float32)
    bt1 = 0.1 * jax.random.normal(keys[3], (C,), jnp.float32)
    w2 = jax.random.normal(keys[4], (C, C, 3, 3), jnp.float32) * 0.2
    b2 = jax.random.normal(keys[5], (C,), jnp.float32) * 0.1
    g2 = 1.0 + 0.1 * jax.random.normal(keys[6], (C,), jnp.float32)
    bt2 = 0.1 * jax.random.normal(keys[7], (C,), jnp.float32)
    params = (w1, b1, g1, bt1, w2, b2, g2, bt2)

    # Input in the PyTorch NCHW convention.
    x = jax.random.normal(keys[8], (N, C, H, W), jnp.float32)

    out = jax.block_until_ready(residual_block_pallas(x, params))
    ref = residual_block_reference(x, params)

    assert out.shape == (N, C, H, W)
    err = float(jnp.max(jnp.abs(out - ref)))
    assert jnp.allclose(out, ref, atol=2e-4, rtol=2e-4), f"max abs err = {err}"

    print("KERNEL_OK")
</pallas_src>

<mosaic_0001>
module attributes {stable_mosaic.version = 11 : i64} {
  func.func @residual_block_kernel(%arg0: memref<8x1024xf32, #tpu.memory_space<vmem>>, %arg1: memref<8x42xf32, #tpu.memory_space<vmem>>, %arg2: memref<4x768xf32, #tpu.memory_space<vmem>>, %arg3: memref<8x1024xf32, #tpu.memory_space<vmem>>, %arg4: memref<8x1024xf32, #tpu.memory_space<vmem>>) attributes {dimension_semantics = [], scalar_prefetch = 0 : i64, scratch_operands = 2 : i64, tpu.core_type = #tpu.core_type<tc>} {
    %c0 = arith.constant 0 : index
    %c0_0 = arith.constant 0 : index
    %0 = vector.load %arg1[%c0, %c0_0] : memref<8x42xf32, #tpu.memory_space<vmem>>, vector<8x42xf32>
    %c4 = arith.constant 4 : index
    %c128 = arith.constant 128 : index
    %1 = vector.load %arg0[%c4, %c128] : memref<8x1024xf32, #tpu.memory_space<vmem>>, vector<4x768xf32>
    %c0_1 = arith.constant 0 : index
    %c128_2 = arith.constant 128 : index
    %2 = vector.load %arg0[%c0_1, %c128_2] : memref<8x1024xf32, #tpu.memory_space<vmem>>, vector<4x768xf32>
    %c0_3 = arith.constant 0 : index
    %c0_4 = arith.constant 0 : index
    %3 = vector.load %arg0[%c0_3, %c0_4] : memref<8x1024xf32, #tpu.memory_space<vmem>>, vector<1x1024xf32>
    %4 = vector.shape_cast %3 : vector<1x1024xf32> to vector<1x1024xf32>
    %5 = vector.broadcast %4 : vector<1x1024xf32> to vector<4x1024xf32>
    %c0_5 = arith.constant 0 : index
    %c0_6 = arith.constant 0 : index
    %6 = vector.load %arg3[%c0_5, %c0_6] : memref<8x1024xf32, #tpu.memory_space<vmem>>, vector<4x1024xf32>
    tpu.vector_store %arg3[%c0_5, %c0_6], %5 {strides = array<i32>} : memref<8x1024xf32, #tpu.memory_space<vmem>>, vector<4x1024xf32>,
    %c2 = arith.constant 2 : index
    %c0_7 = arith.constant 0 : index
    %7 = vector.load %arg0[%c2, %c0_7] : memref<8x1024xf32, #tpu.memory_space<vmem>>, vector<1x1024xf32>
    %8 = vector.shape_cast %7 : vector<1x1024xf32> to vector<1x1024xf32>
    %9 = vector.broadcast %8 : vector<1x1024xf32> to vector<4x1024xf32>
    %c4_8 = arith.constant 4 : index
    %c0_9 = arith.constant 0 : index
    %10 = vector.load %arg3[%c4_8, %c0_9] : memref<8x1024xf32, #tpu.memory_space<vmem>>, vector<4x1024xf32>
    tpu.vector_store %arg3[%c4_8, %c0_9], %9 {strides = array<i32>} : memref<8x1024xf32, #tpu.memory_space<vmem>>, vector<4x1024xf32>,
    %c1 = arith.constant 1 : index
    %c0_10 = arith.constant 0 : index
    %11 = vector.load %arg0[%c1, %c0_10] : memref<8x1024xf32, #tpu.memory_space<vmem>>, vector<1x1024xf32>
    %12 = vector.shape_cast %11 : vector<1x1024xf32> to vector<1x1024xf32>
    %13 = vector.broadcast %12 : vector<1x1024xf32> to vector<4x1024xf32>
    %c0_11 = arith.constant 0 : index
    %c0_12 = arith.constant 0 : index
    %14 = vector.load %arg4[%c0_11, %c0_12] : memref<8x1024xf32, #tpu.memory_space<vmem>>, vector<4x1024xf32>
    tpu.vector_store %arg4[%c0_11, %c0_12], %13 {strides = array<i32>} : memref<8x1024xf32, #tpu.memory_space<vmem>>, vector<4x1024xf32>,
    %c3 = arith.constant 3 : index
    %c0_13 = arith.constant 0 : index
    %15 = vector.load %arg0[%c3, %c0_13] : memref<8x1024xf32, #tpu.memory_space<vmem>>, vector<1x1024xf32>
    %16 = vector.shape_cast %15 : vector<1x1024xf32> to vector<1x1024xf32>
    %17 = vector.broadcast %16 : vector<1x1024xf32> to vector<4x1024xf32>
    %c4_14 = arith.constant 4 : index
    %c0_15 = arith.constant 0 : index
    %18 = vector.load %arg4[%c4_14, %c0_15] : memref<8x1024xf32, #tpu.memory_space<vmem>>, vector<4x1024xf32>
    tpu.vector_store %arg4[%c4_14, %c0_15], %17 {strides = array<i32>} : memref<8x1024xf32, #tpu.memory_space<vmem>>, vector<4x1024xf32>,
    %19 = vector.extract_strided_slice %0 {offsets = [0, 0], sizes = [8, 1], strides = [1, 1]} : vector<8x42xf32> to vector<8x1xf32>
    %c0_16 = arith.constant 0 : index
    %c109 = arith.constant 109 : index
    %20 = vector.load %arg3[%c0_16, %c109] : memref<8x1024xf32, #tpu.memory_space<vmem>>, vector<8x768xf32>
    %21 = vector.broadcast %19 : vector<8x1xf32> to vector<8x768xf32>
    %22 = arith.mulf %21, %20 : vector<8x768xf32>
    %23 = vector.extract_strided_slice %0 {offsets = [0, 1], sizes = [8, 1], strides = [1, 1]} : vector<8x42xf32> to vector<8x1xf32>
    %c0_17 = arith.constant 0 : index
    %c109_18 = arith.constant 109 : index
    %24 = vector.load %arg4[%c0_17, %c109_18] : memref<8x1024xf32, #tpu.memory_space<vmem>>, vector<8x768xf32>
    %25 = vector.broadcast %23 : vector<8x1xf32> to vector<8x768xf32>
    %26 = arith.mulf %25, %24 : vector<8x768xf32>
    %27 = arith.addf %22, %26 : vector<8x768xf32>
    %28 = vector.extract_strided_slice %0 {offsets = [0, 2], sizes = [8, 1], strides = [1, 1]} : vector<8x42xf32> to vector<8x1xf32>
    %c0_19 = arith.constant 0 : index
    %c110 = arith.constant 110 : index
    %29 = vector.load %arg3[%c0_19, %c110] : memref<8x1024xf32, #tpu.memory_space<vmem>>, vector<8x768xf32>
    %30 = vector.broadcast %28 : vector<8x1xf32> to vector<8x768xf32>
    %31 = arith.mulf %30, %29 : vector<8x768xf32>
    %32 = vector.extract_strided_slice %0 {offsets = [0, 3], sizes = [8, 1], strides = [1, 1]} : vector<8x42xf32> to vector<8x1xf32>
    %c0_20 = arith.constant 0 : index
    %c110_21 = arith.constant 110 : index
    %33 = vector.load %arg4[%c0_20, %c110_21] : memref<8x1024xf32, #tpu.memory_space<vmem>>, vector<8x768xf32>
    %34 = vector.broadcast %32 : vector<8x1xf32> to vector<8x768xf32>
    %35 = arith.mulf %34, %33 : vector<8x768xf32>
    %36 = arith.addf %31, %35 : vector<8x768xf32>
    %37 = arith.addf %27, %36 : vector<8x768xf32>
    %38 = vector.extract_strided_slice %0 {offsets = [0, 4], sizes = [8, 1], strides = [1, 1]} : vector<8x42xf32> to vector<8x1xf32>
    %c0_22 = arith.constant 0 : index
    %c111 = arith.constant 111 : index
    %39 = vector.load %arg3[%c0_22, %c111] : memref<8x1024xf32, #tpu.memory_space<vmem>>, vector<8x768xf32>
    %40 = vector.broadcast %38 : vector<8x1xf32> to vector<8x768xf32>
    %41 = arith.mulf %40, %39 : vector<8x768xf32>
    %42 = vector.extract_strided_slice %0 {offsets = [0, 5], sizes = [8, 1], strides = [1, 1]} : vector<8x42xf32> to vector<8x1xf32>
    %c0_23 = arith.constant 0 : index
    %c111_24 = arith.constant 111 : index
    %43 = vector.load %arg4[%c0_23, %c111_24] : memref<8x1024xf32, #tpu.memory_space<vmem>>, vector<8x768xf32>
    %44 = vector.broadcast %42 : vector<8x1xf32> to vector<8x768xf32>
    %45 = arith.mulf %44, %43 : vector<8x768xf32>
    %46 = arith.addf %41, %45 : vector<8x768xf32>
    %47 = arith.addf %37, %46 : vector<8x768xf32>
    %48 = vector.extract_strided_slice %0 {offsets = [0, 6], sizes = [8, 1], strides = [1, 1]} : vector<8x42xf32> to vector<8x1xf32>
    %c0_25 = arith.constant 0 : index
    %c127 = arith.constant 127 : index
    %49 = vector.load %arg3[%c0_25, %c127] : memref<8x1024xf32, #tpu.memory_space<vmem>>, vector<8x768xf32>
    %50 = vector.broadcast %48 : vector<8x1xf32> to vector<8x768xf32>
    %51 = arith.mulf %50, %49 : vector<8x768xf32>
    %52 = vector.extract_strided_slice %0 {offsets = [0, 7], sizes = [8, 1], strides = [1, 1]} : vector<8x42xf32> to vector<8x1xf32>
    %c0_26 = arith.constant 0 : index
    %c127_27 = arith.constant 127 : index
    %53 = vector.load %arg4[%c0_26, %c127_27] : memref<8x1024xf32, #tpu.memory_space<vmem>>, vector<8x768xf32>
    %54 = vector.broadcast %52 : vector<8x1xf32> to vector<8x768xf32>
    %55 = arith.mulf %54, %53 : vector<8x768xf32>
    %56 = arith.addf %51, %55 : vector<8x768xf32>
    %57 = vector.extract_strided_slice %0 {offsets = [0, 8], sizes = [8, 1], strides = [1, 1]} : vector<8x42xf32> to vector<8x1xf32>
    %c0_28 = arith.constant 0 : index
    %c128_29 = arith.constant 128 : index
    %58 = vector.load %arg3[%c0_28, %c128_29] : memref<8x1024xf32, #tpu.memory_space<vmem>>, vector<8x768xf32>
    %59 = vector.broadcast %57 : vector<8x1xf32> to vector<8x768xf32>
    %60 = arith.mulf %59, %58 : vector<8x768xf32>
    %61 = vector.extract_strided_slice %0 {offsets = [0, 9], sizes = [8, 1], strides = [1, 1]} : vector<8x42xf32> to vector<8x1xf32>
    %c0_30 = arith.constant 0 : index
    %c128_31 = arith.constant 128 : index
    %62 = vector.load %arg4[%c0_30, %c128_31] : memref<8x1024xf32, #tpu.memory_space<vmem>>, vector<8x768xf32>
    %63 = vector.broadcast %61 : vector<8x1xf32> to vector<8x768xf32>
    %64 = arith.mulf %63, %62 : vector<8x768xf32>
    %65 = arith.addf %60, %64 : vector<8x768xf32>
    %66 = arith.addf %56, %65 : vector<8x768xf32>
    %67 = vector.extract_strided_slice %0 {offsets = [0, 10], sizes = [8, 1], strides = [1, 1]} : vector<8x42xf32> to vector<8x1xf32>
    %c0_32 = arith.constant 0 : index
    %c129 = arith.constant 129 : index
    %68 = vector.load %arg3[%c0_32, %c129] : memref<8x1024xf32, #tpu.memory_space<vmem>>, vector<8x768xf32>
    %69 = vector.broadcast %67 : vector<8x1xf32> to vector<8x768xf32>
    %70 = arith.mulf %69, %68 : vector<8x768xf32>
    %71 = vector.extract_strided_slice %0 {offsets = [0, 11], sizes = [8, 1], strides = [1, 1]} : vector<8x42xf32> to vector<8x1xf32>
    %c0_33 = arith.constant 0 : index
    %c129_34 = arith.constant 129 : index
    %72 = vector.load %arg4[%c0_33, %c129_34] : memref<8x1024xf32, #tpu.memory_space<vmem>>, vector<8x768xf32>
    %73 = vector.broadcast %71 : vector<8x1xf32> to vector<8x768xf32>
    %74 = arith.mulf %73, %72 : vector<8x768xf32>
    %75 = arith.addf %70, %74 : vector<8x768xf32>
    %76 = arith.addf %66, %75 : vector<8x768xf32>
    %77 = vector.extract_strided_slice %0 {offsets = [0, 12], sizes = [8, 1], strides = [1, 1]} : vector<8x42xf32> to vector<8x1xf32>
    %c0_35 = arith.constant 0 : index
    %c145 = arith.constant 145 : index
    %78 = vector.load %arg3[%c0_35, %c145] : memref<8x1024xf32, #tpu.memory_space<vmem>>, vector<8x768xf32>
    %79 = vector.broadcast %77 : vector<8x1xf32> to vector<8x768xf32>
    %80 = arith.mulf %79, %78 : vector<8x768xf32>
    %81 = vector.extract_strided_slice %0 {offsets = [0, 13], sizes = [8, 1], strides = [1, 1]} : vector<8x42xf32> to vector<8x1xf32>
    %c0_36 = arith.constant 0 : index
    %c145_37 = arith.constant 145 : index
    %82 = vector.load %arg4[%c0_36, %c145_37] : memref<8x1024xf32, #tpu.memory_space<vmem>>, vector<8x768xf32>
    %83 = vector.broadcast %81 : vector<8x1xf32> to vector<8x768xf32>
    %84 = arith.mulf %83, %82 : vector<8x768xf32>
    %85 = arith.addf %80, %84 : vector<8x768xf32>
    %86 = vector.extract_strided_slice %0 {offsets = [0, 14], sizes = [8, 1], strides = [1, 1]} : vector<8x42xf32> to vector<8x1xf32>
    %c0_38 = arith.constant 0 : index
    %c146 = arith.constant 146 : index
    %87 = vector.load %arg3[%c0_38, %c146] : memref<8x1024xf32, #tpu.memory_space<vmem>>, vector<8x768xf32>
    %88 = vector.broadcast %86 : vector<8x1xf32> to vector<8x768xf32>
    %89 = arith.mulf %88, %87 : vector<8x768xf32>
    %90 = vector.extract_strided_slice %0 {offsets = [0, 15], sizes = [8, 1], strides = [1, 1]} : vector<8x42xf32> to vector<8x1xf32>
    %c0_39 = arith.constant 0 : index
    %c146_40 = arith.constant 146 : index
    %91 = vector.load %arg4[%c0_39, %c146_40] : memref<8x1024xf32, #tpu.memory_space<vmem>>, vector<8x768xf32>
    %92 = vector.broadcast %90 : vector<8x1xf32> to vector<8x768xf32>
    %93 = arith.mulf %92, %91 : vector<8x768xf32>
    %94 = arith.addf %89, %93 : vector<8x768xf32>
    %95 = arith.addf %85, %94 : vector<8x768xf32>
    %96 = vector.extract_strided_slice %0 {offsets = [0, 16], sizes = [8, 1], strides = [1, 1]} : vector<8x42xf32> to vector<8x1xf32>
    %c0_41 = arith.constant 0 : index
    %c147 = arith.constant 147 : index
    %97 = vector.load %arg3[%c0_41, %c147] : memref<8x1024xf32, #tpu.memory_space<vmem>>, vector<8x768xf32>
    %98 = vector.broadcast %96 : vector<8x1xf32> to vector<8x768xf32>
    %99 = arith.mulf %98, %97 : vector<8x768xf32>
    %100 = vector.extract_strided_slice %0 {offsets = [0, 17], sizes = [8, 1], strides = [1, 1]} : vector<8x42xf32> to vector<8x1xf32>
    %c0_42 = arith.constant 0 : index
    %c147_43 = arith.constant 147 : index
    %101 = vector.load %arg4[%c0_42, %c147_43] : memref<8x1024xf32, #tpu.memory_space<vmem>>, vector<8x768xf32>
    %102 = vector.broadcast %100 : vector<8x1xf32> to vector<8x768xf32>
    %103 = arith.mulf %102, %101 : vector<8x768xf32>
    %104 = arith.addf %99, %103 : vector<8x768xf32>
    %105 = arith.addf %95, %104 : vector<8x768xf32>
    %106 = arith.addf %47, %76 : vector<8x768xf32>
    %107 = arith.addf %106, %105 : vector<8x768xf32>
    %c4_i32 = arith.constant 4 : i32
    %108 = tpu.dynamic_rotate %107 by %c4_i32 dim 0 : vector<8x768xf32>, i32 -> vector<8x768xf32>
    %109 = arith.addf %107, %108 : vector<8x768xf32>
    %110 = vector.extract_strided_slice %109 {offsets = [0, 0], sizes = [4, 768], strides = [1, 1]} : vector<8x768xf32> to vector<4x768xf32>
    %111 = vector.extract_strided_slice %0 {offsets = [0, 36], sizes = [4, 1], strides = [1, 1]} : vector<8x42xf32> to vector<4x1xf32>
    %112 = vector.broadcast %111 : vector<4x1xf32> to vector<4x768xf32>
    %113 = arith.addf %110, %112 : vector<4x768xf32>
    %114 = vector.extract_strided_slice %0 {offsets = [0, 37], sizes = [4, 1], strides = [1, 1]} : vector<8x42xf32> to vector<4x1xf32>
    %115 = vector.extract_strided_slice %0 {offsets = [0, 38], sizes = [4, 1], strides = [1, 1]} : vector<8x42xf32> to vector<4x1xf32>
    %116 = arith.mulf %113, %1 : vector<4x768xf32>
    %cst = arith.constant dense<0.000000e+00> : vector<4xf32>
    %117 = vector.multi_reduction <add>, %116, %cst [1] : vector<4x768xf32> to vector<4xf32>
    %118 = vector.shape_cast %117 : vector<4xf32> to vector<4x1xf32>
    %119 = arith.mulf %116, %116 : vector<4x768xf32>
    %cst_44 = arith.constant dense<0.000000e+00> : vector<4xf32>
    %120 = vector.multi_reduction <add>, %119, %cst_44 [1] : vector<4x768xf32> to vector<4xf32>
    %121 = vector.shape_cast %120 : vector<4xf32> to vector<4x1xf32>
    %cst_45 = arith.constant 0.001953125 : f32
    %122 = vector.broadcast %cst_45 : f32 to vector<4x1xf32>
    %123 = arith.mulf %118, %122 : vector<4x1xf32>
    %cst_46 = arith.constant 0.001953125 : f32
    %124 = vector.broadcast %cst_46 : f32 to vector<4x1xf32>
    %125 = arith.mulf %121, %124 : vector<4x1xf32>
    %126 = arith.mulf %123, %123 : vector<4x1xf32>
    %127 = arith.subf %125, %126 : vector<4x1xf32>
    %cst_47 = arith.constant 9.99999974E-6 : f32
    %128 = vector.broadcast %cst_47 : f32 to vector<4x1xf32>
    %129 = arith.addf %127, %128 : vector<4x1xf32>
    %130 = math.rsqrt %129 : vector<4x1xf32>
    %131 = arith.mulf %114, %130 : vector<4x1xf32>
    %132 = arith.mulf %123, %131 : vector<4x1xf32>
    %133 = arith.subf %115, %132 : vector<4x1xf32>
    %134 = vector.broadcast %131 : vector<4x1xf32> to vector<4x768xf32>
    %135 = arith.mulf %116, %134 : vector<4x768xf32>
    %136 = vector.broadcast %133 : vector<4x1xf32> to vector<4x768xf32>
    %137 = arith.addf %135, %136 : vector<4x768xf32>
    %cst_48 = arith.constant 0.000000e+00 : f32
    %138 = vector.broadcast %cst_48 : f32 to vector<4x768xf32>
    %139 = arith.maximumf %137, %138 : vector<4x768xf32>
    %140 = arith.mulf %139, %1 : vector<4x768xf32>
    %141 = vector.extract_strided_slice %140 {offsets = [0, 0], sizes = [1, 768], strides = [1, 1]} : vector<4x768xf32> to vector<1x768xf32>
    %142 = vector.shape_cast %141 : vector<1x768xf32> to vector<1x768xf32>
    %143 = vector.broadcast %142 : vector<1x768xf32> to vector<4x768xf32>
    %c0_49 = arith.constant 0 : index
    %c128_50 = arith.constant 128 : index
    %144 = vector.load %arg3[%c0_49, %c128_50] : memref<8x1024xf32, #tpu.memory_space<vmem>>, vector<4x768xf32>
    tpu.vector_store %arg3[%c0_49, %c128_50], %143 {strides = array<i32>} : memref<8x1024xf32, #tpu.memory_space<vmem>>, vector<4x768xf32>,
    %145 = vector.extract_strided_slice %140 {offsets = [2, 0], sizes = [1, 768], strides = [1, 1]} : vector<4x768xf32> to vector<1x768xf32>
    %146 = vector.shape_cast %145 : vector<1x768xf32> to vector<1x768xf32>
    %147 = vector.broadcast %146 : vector<1x768xf32> to vector<4x768xf32>
    %c4_51 = arith.constant 4 : index
    %c128_52 = arith.constant 128 : index
    %148 = vector.load %arg3[%c4_51, %c128_52] : memref<8x1024xf32, #tpu.memory_space<vmem>>, vector<4x768xf32>
    tpu.vector_store %arg3[%c4_51, %c128_52], %147 {strides = array<i32>} : memref<8x1024xf32, #tpu.memory_space<vmem>>, vector<4x768xf32>,
    %149 = vector.extract_strided_slice %140 {offsets = [1, 0], sizes = [1, 768], strides = [1, 1]} : vector<4x768xf32> to vector<1x768xf32>
    %150 = vector.shape_cast %149 : vector<1x768xf32> to vector<1x768xf32>
    %151 = vector.broadcast %150 : vector<1x768xf32> to vector<4x768xf32>
    %c0_53 = arith.constant 0 : index
    %c128_54 = arith.constant 128 : index
    %152 = vector.load %arg4[%c0_53, %c128_54] : memref<8x1024xf32, #tpu.memory_space<vmem>>, vector<4x768xf32>
    tpu.vector_store %arg4[%c0_53, %c128_54], %151 {strides = array<i32>} : memref<8x1024xf32, #tpu.memory_space<vmem>>, vector<4x768xf32>,
    %153 = vector.extract_strided_slice %140 {offsets = [3, 0], sizes = [1, 768], strides = [1, 1]} : vector<4x768xf32> to vector<1x768xf32>
    %154 = vector.shape_cast %153 : vector<1x768xf32> to vector<1x768xf32>
    %155 = vector.broadcast %154 : vector<1x768xf32> to vector<4x768xf32>
    %c4_55 = arith.constant 4 : index
    %c128_56 = arith.constant 128 : index
    %156 = vector.load %arg4[%c4_55, %c128_56] : memref<8x1024xf32, #tpu.memory_space<vmem>>, vector<4x768xf32>
    tpu.vector_store %arg4[%c4_55, %c128_56], %155 {strides = array<i32>} : memref<8x1024xf32, #tpu.memory_space<vmem>>, vector<4x768xf32>,
    %157 = vector.extract_strided_slice %0 {offsets = [0, 18], sizes = [8, 1], strides = [1, 1]} : vector<8x42xf32> to vector<8x1xf32>
    %c0_57 = arith.constant 0 : index
    %c109_58 = arith.constant 109 : index
    %158 = vector.load %arg3[%c0_57, %c109_58] : memref<8x1024xf32, #tpu.memory_space<vmem>>, vector<8x768xf32>
    %159 = vector.broadcast %157 : vector<8x1xf32> to vector<8x768xf32>
    %160 = arith.mulf %159, %158 : vector<8x768xf32>
    %161 = vector.extract_strided_slice %0 {offsets = [0, 19], sizes = [8, 1], strides = [1, 1]} : vector<8x42xf32> to vector<8x1xf32>
    %c0_59 = arith.constant 0 : index
    %c109_60 = arith.constant 109 : index
    %162 = vector.load %arg4[%c0_59, %c109_60] : memref<8x1024xf32, #tpu.memory_space<vmem>>, vector<8x768xf32>
    %163 = vector.broadcast %161 : vector<8x1xf32> to vector<8x768xf32>
    %164 = arith.mulf %163, %162 : vector<8x768xf32>
    %165 = arith.addf %160, %164 : vector<8x768xf32>
    %166 = vector.extract_strided_slice %0 {offsets = [0, 20], sizes = [8, 1], strides = [1, 1]} : vector<8x42xf32> to vector<8x1xf32>
    %c0_61 = arith.constant 0 : index
    %c110_62 = arith.constant 110 : index
    %167 = vector.load %arg3[%c0_61, %c110_62] : memref<8x1024xf32, #tpu.memory_space<vmem>>, vector<8x768xf32>
    %168 = vector.broadcast %166 : vector<8x1xf32> to vector<8x768xf32>
    %169 = arith.mulf %168, %167 : vector<8x768xf32>
    %170 = vector.extract_strided_slice %0 {offsets = [0, 21], sizes = [8, 1], strides = [1, 1]} : vector<8x42xf32> to vector<8x1xf32>
    %c0_63 = arith.constant 0 : index
    %c110_64 = arith.constant 110 : index
    %171 = vector.load %arg4[%c0_63, %c110_64] : memref<8x1024xf32, #tpu.memory_space<vmem>>, vector<8x768xf32>
    %172 = vector.broadcast %170 : vector<8x1xf32> to vector<8x768xf32>
    %173 = arith.mulf %172, %171 : vector<8x768xf32>
    %174 = arith.addf %169, %173 : vector<8x768xf32>
    %175 = arith.addf %165, %174 : vector<8x768xf32>
    %176 = vector.extract_strided_slice %0 {offsets = [0, 22], sizes = [8, 1], strides = [1, 1]} : vector<8x42xf32> to vector<8x1xf32>
    %c0_65 = arith.constant 0 : index
    %c111_66 = arith.constant 111 : index
    %177 = vector.load %arg3[%c0_65, %c111_66] : memref<8x1024xf32, #tpu.memory_space<vmem>>, vector<8x768xf32>
    %178 = vector.broadcast %176 : vector<8x1xf32> to vector<8x768xf32>
    %179 = arith.mulf %178, %177 : vector<8x768xf32>
    %180 = vector.extract_strided_slice %0 {offsets = [0, 23], sizes = [8, 1], strides = [1, 1]} : vector<8x42xf32> to vector<8x1xf32>
    %c0_67 = arith.constant 0 : index
    %c111_68 = arith.constant 111 : index
    %181 = vector.load %arg4[%c0_67, %c111_68] : memref<8x1024xf32, #tpu.memory_space<vmem>>, vector<8x768xf32>
    %182 = vector.broadcast %180 : vector<8x1xf32> to vector<8x768xf32>
    %183 = arith.mulf %182, %181 : vector<8x768xf32>
    %184 = arith.addf %179, %183 : vector<8x768xf32>
    %185 = arith.addf %175, %184 : vector<8x768xf32>
    %186 = vector.extract_strided_slice %0 {offsets = [0, 24], sizes = [8, 1], strides = [1, 1]} : vector<8x42xf32> to vector<8x1xf32>
    %c0_69 = arith.constant 0 : index
    %c127_70 = arith.constant 127 : index
    %187 = vector.load %arg3[%c0_69, %c127_70] : memref<8x1024xf32, #tpu.memory_space<vmem>>, vector<8x768xf32>
    %188 = vector.broadcast %186 : vector<8x1xf32> to vector<8x768xf32>
    %189 = arith.mulf %188, %187 : vector<8x768xf32>
    %190 = vector.extract_strided_slice %0 {offsets = [0, 25], sizes = [8, 1], strides = [1, 1]} : vector<8x42xf32> to vector<8x1xf32>
    %c0_71 = arith.constant 0 : index
    %c127_72 = arith.constant 127 : index
    %191 = vector.load %arg4[%c0_71, %c127_72] : memref<8x1024xf32, #tpu.memory_space<vmem>>, vector<8x768xf32>
    %192 = vector.broadcast %190 : vector<8x1xf32> to vector<8x768xf32>
    %193 = arith.mulf %192, %191 : vector<8x768xf32>
    %194 = arith.addf %189, %193 : vector<8x768xf32>
    %195 = vector.extract_strided_slice %0 {offsets = [0, 26], sizes = [8, 1], strides = [1, 1]} : vector<8x42xf32> to vector<8x1xf32>
    %c0_73 = arith.constant 0 : index
    %c128_74 = arith.constant 128 : index
    %196 = vector.load %arg3[%c0_73, %c128_74] : memref<8x1024xf32, #tpu.memory_space<vmem>>, vector<8x768xf32>
    %197 = vector.broadcast %195 : vector<8x1xf32> to vector<8x768xf32>
    %198 = arith.mulf %197, %196 : vector<8x768xf32>
    %199 = vector.extract_strided_slice %0 {offsets = [0, 27], sizes = [8, 1], strides = [1, 1]} : vector<8x42xf32> to vector<8x1xf32>
    %c0_75 = arith.constant 0 : index
    %c128_76 = arith.constant 128 : index
    %200 = vector.load %arg4[%c0_75, %c128_76] : memref<8x1024xf32, #tpu.memory_space<vmem>>, vector<8x768xf32>
    %201 = vector.broadcast %199 : vector<8x1xf32> to vector<8x768xf32>
    %202 = arith.mulf %201, %200 : vector<8x768xf32>
    %203 = arith.addf %198, %202 : vector<8x768xf32>
    %204 = arith.addf %194, %203 : vector<8x768xf32>
    %205 = vector.extract_strided_slice %0 {offsets = [0, 28], sizes = [8, 1], strides = [1, 1]} : vector<8x42xf32> to vector<8x1xf32>
    %c0_77 = arith.constant 0 : index
    %c129_78 = arith.constant 129 : index
    %206 = vector.load %arg3[%c0_77, %c129_78] : memref<8x1024xf32, #tpu.memory_space<vmem>>, vector<8x768xf32>
    %207 = vector.broadcast %205 : vector<8x1xf32> to vector<8x768xf32>
    %208 = arith.mulf %207, %206 : vector<8x768xf32>
    %209 = vector.extract_strided_slice %0 {offsets = [0, 29], sizes = [8, 1], strides = [1, 1]} : vector<8x42xf32> to vector<8x1xf32>
    %c0_79 = arith.constant 0 : index
    %c129_80 = arith.constant 129 : index
    %210 = vector.load %arg4[%c0_79, %c129_80] : memref<8x1024xf32, #tpu.memory_space<vmem>>, vector<8x768xf32>
    %211 = vector.broadcast %209 : vector<8x1xf32> to vector<8x768xf32>
    %212 = arith.mulf %211, %210 : vector<8x768xf32>
    %213 = arith.addf %208, %212 : vector<8x768xf32>
    %214 = arith.addf %204, %213 : vector<8x768xf32>
    %215 = vector.extract_strided_slice %0 {offsets = [0, 30], sizes = [8, 1], strides = [1, 1]} : vector<8x42xf32> to vector<8x1xf32>
    %c0_81 = arith.constant 0 : index
    %c145_82 = arith.constant 145 : index
    %216 = vector.load %arg3[%c0_81, %c145_82] : memref<8x1024xf32, #tpu.memory_space<vmem>>, vector<8x768xf32>
    %217 = vector.broadcast %215 : vector<8x1xf32> to vector<8x768xf32>
    %218 = arith.mulf %217, %216 : vector<8x768xf32>
    %219 = vector.extract_strided_slice %0 {offsets = [0, 31], sizes = [8, 1], strides = [1, 1]} : vector<8x42xf32> to vector<8x1xf32>
    %c0_83 = arith.constant 0 : index
    %c145_84 = arith.constant 145 : index
    %220 = vector.load %arg4[%c0_83, %c145_84] : memref<8x1024xf32, #tpu.memory_space<vmem>>, vector<8x768xf32>
    %221 = vector.broadcast %219 : vector<8x1xf32> to vector<8x768xf32>
    %222 = arith.mulf %221, %220 : vector<8x768xf32>
    %223 = arith.addf %218, %222 : vector<8x768xf32>
    %224 = vector.extract_strided_slice %0 {offsets = [0, 32], sizes = [8, 1], strides = [1, 1]} : vector<8x42xf32> to vector<8x1xf32>
    %c0_85 = arith.constant 0 : index
    %c146_86 = arith.constant 146 : index
    %225 = vector.load %arg3[%c0_85, %c146_86] : memref<8x1024xf32, #tpu.memory_space<vmem>>, vector<8x768xf32>
    %226 = vector.broadcast %224 : vector<8x1xf32> to vector<8x768xf32>
    %227 = arith.mulf %226, %225 : vector<8x768xf32>
    %228 = vector.extract_strided_slice %0 {offsets = [0, 33], sizes = [8, 1], strides = [1, 1]} : vector<8x42xf32> to vector<8x1xf32>
    %c0_87 = arith.constant 0 : index
    %c146_88 = arith.constant 146 : index
    %229 = vector.load %arg4[%c0_87, %c146_88] : memref<8x1024xf32, #tpu.memory_space<vmem>>, vector<8x768xf32>
    %230 = vector.broadcast %228 : vector<8x1xf32> to vector<8x768xf32>
    %231 = arith.mulf %230, %229 : vector<8x768xf32>
    %232 = arith.addf %227, %231 : vector<8x768xf32>
    %233 = arith.addf %223, %232 : vector<8x768xf32>
    %234 = vector.extract_strided_slice %0 {offsets = [0, 34], sizes = [8, 1], strides = [1, 1]} : vector<8x42xf32> to vector<8x1xf32>
    %c0_89 = arith.constant 0 : index
    %c147_90 = arith.constant 147 : index
    %235 = vector.load %arg3[%c0_89, %c147_90] : memref<8x1024xf32, #tpu.memory_space<vmem>>, vector<8x768xf32>
    %236 = vector.broadcast %234 : vector<8x1xf32> to vector<8x768xf32>
    %237 = arith.mulf %236, %235 : vector<8x768xf32>
    %238 = vector.extract_strided_slice %0 {offsets = [0, 35], sizes = [8, 1], strides = [1, 1]} : vector<8x42xf32> to vector<8x1xf32>
    %c0_91 = arith.constant 0 : index
    %c147_92 = arith.constant 147 : index
    %239 = vector.load %arg4[%c0_91, %c147_92] : memref<8x1024xf32, #tpu.memory_space<vmem>>, vector<8x768xf32>
    %240 = vector.broadcast %238 : vector<8x1xf32> to vector<8x768xf32>
    %241 = arith.mulf %240, %239 : vector<8x768xf32>
    %242 = arith.addf %237, %241 : vector<8x768xf32>
    %243 = arith.addf %233, %242 : vector<8x768xf32>
    %244 = arith.addf %185, %214 : vector<8x768xf32>
    %245 = arith.addf %244, %243 : vector<8x768xf32>
    %c4_i32_93 = arith.constant 4 : i32
    %246 = tpu.dynamic_rotate %245 by %c4_i32_93 dim 0 : vector<8x768xf32>, i32 -> vector<8x768xf32>
    %247 = arith.addf %245, %246 : vector<8x768xf32>
    %248 = vector.extract_strided_slice %247 {offsets = [0, 0], sizes = [4, 768], strides = [1, 1]} : vector<8x768xf32> to vector<4x768xf32>
    %249 = vector.extract_strided_slice %0 {offsets = [0, 39], sizes = [4, 1], strides = [1, 1]} : vector<8x42xf32> to vector<4x1xf32>
    %250 = vector.broadcast %249 : vector<4x1xf32> to vector<4x768xf32>
    %251 = arith.addf %248, %250 : vector<4x768xf32>
    %252 = vector.extract_strided_slice %0 {offsets = [0, 40], sizes = [4, 1], strides = [1, 1]} : vector<8x42xf32> to vector<4x1xf32>
    %253 = vector.extract_strided_slice %0 {offsets = [0, 41], sizes = [4, 1], strides = [1, 1]} : vector<8x42xf32> to vector<4x1xf32>
    %254 = arith.mulf %251, %1 : vector<4x768xf32>
    %cst_94 = arith.constant dense<0.000000e+00> : vector<4xf32>
    %255 = vector.multi_reduction <add>, %254, %cst_94 [1] : vector<4x768xf32> to vector<4xf32>
    %256 = vector.shape_cast %255 : vector<4xf32> to vector<4x1xf32>
    %257 = arith.mulf %254, %254 : vector<4x768xf32>
    %cst_95 = arith.constant dense<0.000000e+00> : vector<4xf32>
    %258 = vector.multi_reduction <add>, %257, %cst_95 [1] : vector<4x768xf32> to vector<4xf32>
    %259 = vector.shape_cast %258 : vector<4xf32> to vector<4x1xf32>
    %cst_96 = arith.constant 0.001953125 : f32
    %260 = vector.broadcast %cst_96 : f32 to vector<4x1xf32>
    %261 = arith.mulf %256, %260 : vector<4x1xf32>
    %cst_97 = arith.constant 0.001953125 : f32
    %262 = vector.broadcast %cst_97 : f32 to vector<4x1xf32>
    %263 = arith.mulf %259, %262 : vector<4x1xf32>
    %264 = arith.mulf %261, %261 : vector<4x1xf32>
    %265 = arith.subf %263, %264 : vector<4x1xf32>
    %cst_98 = arith.constant 9.99999974E-6 : f32
    %266 = vector.broadcast %cst_98 : f32 to vector<4x1xf32>
    %267 = arith.addf %265, %266 : vector<4x1xf32>
    %268 = math.rsqrt %267 : vector<4x1xf32>
    %269 = arith.mulf %252, %268 : vector<4x1xf32>
    %270 = arith.mulf %261, %269 : vector<4x1xf32>
    %271 = arith.subf %253, %270 : vector<4x1xf32>
    %272 = vector.broadcast %269 : vector<4x1xf32> to vector<4x768xf32>
    %273 = arith.mulf %254, %272 : vector<4x768xf32>
    %274 = vector.broadcast %271 : vector<4x1xf32> to vector<4x768xf32>
    %275 = arith.addf %273, %274 : vector<4x768xf32>
    %276 = arith.addf %275, %2 : vector<4x768xf32>
    %cst_99 = arith.constant 0.000000e+00 : f32
    %277 = vector.broadcast %cst_99 : f32 to vector<4x768xf32>
    %278 = arith.maximumf %276, %277 : vector<4x768xf32>
    %c0_100 = arith.constant 0 : index
    %c0_101 = arith.constant 0 : index
    %279 = vector.load %arg2[%c0_100, %c0_101] : memref<4x768xf32, #tpu.memory_space<vmem>>, vector<4x768xf32>
    tpu.vector_store %arg2[%c0_100, %c0_101], %278 {strides = array<i32>} : memref<4x768xf32, #tpu.memory_space<vmem>>, vector<4x768xf32>,
    return
  }
}

</mosaic_0001>

<bundles_post_ra>
// kernel: residual_block_pallas.1
= control target key start
LH: loop header
LB: loop body
LE: loop exit
PB: predicated region body
PF: predicated region fallthrough
CT: control target
= control target key end

     0   :  { %v2426_v0 = vmov 8   ;;  %v2427_v2 = vmov 10   ;;  %v28_v5 = vlaneseq  ;;  %v2428_v8 = vmov 9   ;;  %s2444_s27 = smov 127   ;;  %s2445_s28 = smov 126   ;;  %s3994_s1 = inlined_call_operand.vmem [shape: f32[8,42], index: 1, kind: input, shape index: {}]   ;;  %s3995_s0 = inlined_call_operand.vmem [shape: f32[8,1024], index: 0, kind: input, shape index: {}]   ;;  %s3996_s2 = inlined_call_operand.vmem [shape: f32[4,768], index: 2, kind: output, shape index: {}]  }
   0x1   :  { %2378 = vset.pattern.permute.xlu0 %v2426_v0  ;;  %v2493_v1 = vld [vmem:[%s3994_s1] sm:$0xff]  ;;  %2380 = vset.pattern.permute.xlu1 %v2427_v2  ;;  %v2429_v9 = vmov 11   ;;  %v2430_v28 = vmov 14   ;;  %v2431_v29 = vmov 15   ;;  %v2432_v50 = vmov 16   ;;  %s2446_s29 = smov 110  }
   0x2   :  { %451 = vperm.xlu0 %2378, %v2493_v1   ;;  %521 = vperm.xlu1 %2380, %v2493_v1   ;;  %v24_v3 = vld [vmem:[%s3995_s0] ss:$8 sm:$0xf]  ;;  %v2323_v6 = vld [vmem:[%s3995_s0 + $0x2] ss:$8 sm:$0xf] }
   0x3   :  { %v25_v4 = vld [vmem:[%s3995_s0] ss:$8 sm:$0xf0]  ;;  %v2324_v7 = vld [vmem:[%s3995_s0 + $0x2] ss:$8 sm:$0xf0] }
   0x4   :  { %v2509_v10 = vor.u32 %v25_v4, %v24_v3  ;;  %v2511_v11 = vshrl.u32 %v28_v5, 7  ;;  %v2513_v12 = vor.u32 %v2324_v7, %v2323_v6  ;;  %v2325_v13 = vld [vmem:[%s3995_s0 + $0x1] ss:$8 sm:$0xf]  ;;  %v2433_v51 = vmov 2   ;;  %s2447_s30 = smov 92  }
   0x5   :  { %v2326_v14 = vld [vmem:[%s3995_s0 + $0x1] ss:$8 sm:$0xf0]  ;;  %v2327_v15 = vld [vmem:[%s3995_s0 + $0x3] ss:$8 sm:$0xf] }
   0x6   :  { %2379 = vset.pattern.permute.xlu0 %v2428_v8  ;;  %2381 = vset.pattern.permute.xlu1 %v2429_v9  ;;  %v2527_v16 = vsub.s32 2, %v2511_v11  ;;  %v2529_v17 = vor.u32 %v2326_v14, %v2325_v13  ;;  %v2328_v18 = vld [vmem:[%s3995_s0 + $0x3] ss:$8 sm:$0xf0]  ;;  %v2535_v19 = vsub.s32 1, %v2511_v11  ;;  %v46_v20 = vsub.s32 4, %v2511_v11 }
   0x7   :  { %461 = vperm.xlu0 %2379, %v2493_v1   ;;  %539 = vperm.xlu1 %2381, %v2493_v1   ;;  %v2538_v21 = vor.u32 %v2328_v18, %v2327_v15  ;;  %v2541_v22 = vsub.s32 3, %v2511_v11  ;;  %v54_v23 = vsub.s32 6, %v2511_v11  ;;  %v50_v33 = vsub.s32 5, %v2511_v11  ;;  %s2449_s3 = smov 19   ;;  %s2450_s12 = smov 109  }
   0x8   :  { %v39_v24 = vrot.slane %v2509_v10, %v2527_v16  ;;  %v92_v25 = vrot.slane %v2513_v12, %v2527_v16  ;;  %v145_v26 = vrot.slane %v2529_v17, %v2527_v16  ;;  %v35_v27 = vrot.slane %v2509_v10, %v2535_v19  ;;  %s2453_s19 = smov 1  }
   0x9   :  { %v198_v30 = vrot.slane %v2538_v21, %v2527_v16  ;;  %v88_v31 = vrot.slane %v2513_v12, %v2535_v19  ;;  %v141_v32 = vrot.slane %v2529_v17, %v2535_v19  ;;  %v194_v34 = vrot.slane %v2538_v21, %v2535_v19 }
   0xa   :  { %70 = vst [vmem:[#allocation2 + $0x18] sm:$0xf] %v39_v24  ;;  %123 = vst [vmem:[#allocation2 + $0x18] sm:$0xf0] %v92_v25  ;;  %v47_v35 = vrot.slane %v2509_v10, %v46_v20  ;;  %v100_v36 = vrot.slane %v2513_v12, %v46_v20  ;;  %v58_v37 = vsub.s32 7, %v2511_v11  ;;  %v153_v38 = vrot.slane %v2529_v17, %v46_v20 }
   0xb   :  { %2382 = vset.pattern.permute.xlu1 %v2430_v28  ;;  %2383 = vset.pattern.permute.xlu0 %v2431_v29  ;;  %176 = vst [vmem:[#allocation3 + $0x10] sm:$0xf] %v145_v26  ;;  %69 = vst [vmem:[#allocation2] sm:$0xf] %v35_v27  ;;  %v206_v39 = vrot.slane %v2538_v21, %v46_v20  ;;  %v43_v40 = vrot.slane %v2509_v10, %v2541_v22  ;;  %v2434_v58 = vmov 17   ;;  %v2435_v59 = vmov 7  }
   0xc   :  { %627 = vperm.xlu1 %2382, %v2493_v1   ;;  %638 = vperm.xlu0 %2383, %v2493_v1   ;;  %229 = vst [vmem:[#allocation3 + $0x10] sm:$0xf0] %v198_v30  ;;  %122 = vst [vmem:[#allocation2] sm:$0xf0] %v88_v31  ;;  %v96_v41 = vrot.slane %v2513_v12, %v2541_v22  ;;  %v149_v42 = vrot.slane %v2529_v17, %v2541_v22  ;;  %v2436_v60 = vmov 3   ;;  %v2437_v61 = vmov 12  }
   0xd   :  { %175 = vst [vmem:[#allocation3 + $0x18] sm:$0xf] %v141_v32  ;;  %228 = vst [vmem:[#allocation3 + $0x18] sm:$0xf0] %v194_v34  ;;  %v202_v43 = vrot.slane %v2538_v21, %v2541_v22  ;;  %v55_v44 = vrot.slane %v2509_v10, %v54_v23  ;;  %v108_v45 = vrot.slane %v2513_v12, %v54_v23  ;;  %v2438_v62 = vmov 6  }
   0xe   :  { %72 = vst [vmem:[#allocation2 + $0x8] sm:$0xf] %v47_v35  ;;  %125 = vst [vmem:[#allocation2 + $0x8] sm:$0xf0] %v100_v36  ;;  %v161_v46 = vrot.slane %v2529_v17, %v54_v23  ;;  %v214_v47 = vrot.slane %v2538_v21, %v54_v23  ;;  %v51_v48 = vrot.slane %v2509_v10, %v50_v33  ;;  %v2439_v63 = vmov 4  }
   0xf   :  { %178 = vst [vmem:[#allocation3 + $0x28] sm:$0xf] %v153_v38  ;;  %231 = vst [vmem:[#allocation3 + $0x28] sm:$0xf0] %v206_v39  ;;  %v104_v49 = vrot.slane %v2513_v12, %v50_v33  ;;  %v157_v52 = vrot.slane %v2529_v17, %v50_v33  ;;  %v210_v53 = vrot.slane %v2538_v21, %v50_v33  ;;  %v2440_v0 = vmov 5  }
  0x10   :  { %71 = vst [vmem:[#allocation2 + $0x10] sm:$0xf] %v43_v40  ;;  %124 = vst [vmem:[#allocation2 + $0x10] sm:$0xf0] %v96_v41  ;;  %2384 = vset.pattern.permute.xlu1 %v2432_v50  ;;  %2386 = vset.pattern.permute.xlu0 %v2433_v51  ;;  %v59_v54 = vrot.slane %v2509_v10, %v58_v37  ;;  %v112_v55 = vrot.slane %v2513_v12, %v58_v37  ;;  %v2441_v2 = vmov 13   ;;  %v2442_v3 = vmov 1  }
  0x11   :  { %177 = vst [vmem:[#allocation3 + $0x20] sm:$0xf] %v149_v42  ;;  %230 = vst [vmem:[#allocation3 + $0x20] sm:$0xf0] %v202_v43  ;;  %697 = vperm.xlu1 %2384, %v2493_v1   ;;  %280 = vperm.xlu0 %2386, %v2493_v1   ;;  %v165_v56 = vrot.slane %v2529_v17, %v58_v37  ;;  %v218_v57 = vrot.slane %v2538_v21, %v58_v37  ;;  %v2599_v4 = vsub.s32 0, %v2511_v11  ;;  %v2443_v5 = vmov 0  }
  0x12   :  { %74 = vst [vmem:[#allocation2 + $0x28] sm:$0xf] %v55_v44  ;;  %127 = vst [vmem:[#allocation2 + $0x28] sm:$0xf0] %v108_v45  ;;  %v2611_v14 = vld [vmem:[#allocation2 + $0x18] sm:$0xff]  ;;  %vm329_vm0 = vcmask 1039360  }
  0x13   :  { %180 = vst [vmem:[#allocation3 + $0x30] sm:$0xf] %v161_v46  ;;  %233 = vst [vmem:[#allocation3 + $0x30] sm:$0xf0] %v214_v47  ;;  %v31_v6 = vrot.slane %v2509_v10, %v2599_v4  ;;  %v84_v7 = vrot.slane %v2513_v12, %v2599_v4  ;;  %v137_v8 = vrot.slane %v2529_v17, %v2599_v4  ;;  %v2613_v15 = vld [vmem:[#allocation3 + $0x10] sm:$0xff]  ;;  %v2615_v10 = vld [vmem:[#allocation2] sm:$0xff] }
  0x14   :  { %73 = vst [vmem:[#allocation2 + $0x20] sm:$0xf] %v51_v48  ;;  %126 = vst [vmem:[#allocation2 + $0x20] sm:$0xf0] %v104_v49  ;;  %v190_v9 = vrot.slane %v2538_v21, %v2599_v4  ;;  %v2617_v12 = vld [vmem:[#allocation3 + $0x18] sm:$0xff]  ;;  %vm400_vm1 = vcmask 1031168  }
  0x15   :  { %179 = vst [vmem:[#allocation3 + $0x8] sm:$0xf] %v157_v52  ;;  %232 = vst [vmem:[#allocation3 + $0x8] sm:$0xf0] %v210_v53  ;;  %2385 = vset.pattern.permute.xlu1 %v2434_v58  ;;  %2389 = vset.pattern.permute.xlu0 %v2435_v59  ;;  %v2629_v27 = vld [vmem:[#allocation2 + $0x8] sm:$0xff]  ;;  %vm787_vm2 = vcmask 900096  }
  0x16   :  { %75 = vst [vmem:[#allocation2 + $0x38] sm:$0xf] %v59_v54  ;;  %128 = vst [vmem:[#allocation2 + $0x38] sm:$0xf0] %v112_v55  ;;  %708 = vperm.xlu1 %2385, %v2493_v1   ;;  %433 = vperm.xlu0 %2389, %v2493_v1   ;;  %v2619_v17 = vld [vmem:[#allocation3 + $0x28] sm:$0xff]  ;;  %vm829_vm3 = vcmask 752640  }
  0x17   :  { %181 = vst [vmem:[#allocation3 + $0x38] sm:$0xf] %v165_v56  ;;  %234 = vst [vmem:[#allocation3 + $0x38] sm:$0xf0] %v218_v57  ;;  %v2631_v28 = vld [vmem:[#allocation2 + $0x10] sm:$0xff]  ;;  %vm871_vm4 = vcmask 154624  }
  0x18   :  { %68 = vst [vmem:[#allocation2 + $0x30] sm:$0xf] %v31_v6  ;;  %121 = vst [vmem:[#allocation2 + $0x30] sm:$0xf0] %v84_v7  ;;  %v2621_v20 = vld [vmem:[#allocation3 + $0x20] sm:$0xff]  ;;  %vm908_vm5 = vcmask 891904  }
  0x19   :  { %174 = vst [vmem:[#allocation3] sm:$0xf] %v137_v8  ;;  %227 = vst [vmem:[#allocation3] sm:$0xf0] %v190_v9  ;;  %v2643_v37 = vld [vmem:[#allocation2 + $0x28] sm:$0xff]  ;;  %vm1015_vm6 = vcmask 1043456  }
  0x1a   :  { %2387 = vset.pattern.permute.xlu1 %v2436_v60  ;;  %2392 = vset.pattern.permute.xlu0 %v2437_v61  ;;  %v2635_v33 = vld [vmem:[#allocation3 + $0x30] sm:$0xff] }
  0x1b   :  { %291 = vperm.xlu1 %2387, %v2493_v1   ;;  %598 = vperm.xlu0 %2392, %v2493_v1   ;;  %v2645_v38 = vld [vmem:[#allocation2 + $0x20] sm:$0xff] }
  0x1c   :  { %v2637_v34 = vld [vmem:[#allocation3 + $0x8] sm:$0xff] }
  0x1f   :  { %2388 = vset.pattern.permute.xlu1 %v2438_v62  ;;  %2394 = vset.pattern.permute.xlu0 %v2443_v5 }
  0x20   :  { %422 = vperm.xlu1 %2388, %v2493_v1  }
  0x24   :  { %2390 = vset.pattern.permute.xlu1 %v2439_v63 }
  0x25   :  { %351 = vperm.xlu1 %2390, %v2493_v1  }
  0x29   :  { %2391 = vset.pattern.permute.xlu1 %v2440_v0 }
  0x2a   :  { %362 = vperm.xlu1 %2391, %v2493_v1  }
  0x2e   :  { %2393 = vset.pattern.permute.xlu1 %v2441_v2 }
  0x2f   :  { %609 = vperm.xlu1 %2393, %v2493_v1  }
  0x33   :  { %2395 = vset.pattern.permute.xlu1 %v2442_v3 }
  0x7d   :  { %v452_v11 = vpop.permute.xlu0 %451  ;;  %v2609_v13 = vpop.permute.xlu1 %521 }
  0x7e   :  { %v455_v21 = vmul.f32 %v452_v11, %v2611_v14  ;;  %v454_v24 = vmul.f32 %v452_v11, %v2615_v10  ;;  %v457_v35 = vmul.f32 %v452_v11, %v2629_v27  ;;  %v456_v36 = vmul.f32 %v452_v11, %v2631_v28 }
  0x7f   :  { %v459_v44 = vmul.f32 %v452_v11, %v2643_v37  ;;  %v458_v45 = vmul.f32 %v452_v11, %v2645_v38  ;;  %v525_v46 = vmul.f32 %v2609_v13, %v2611_v14  ;;  %v524_v47 = vmul.f32 %v2609_v13, %v2615_v10 }
  0x80   :  { %v527_v54 = vmul.f32 %v2609_v13, %v2629_v27  ;;  %v526_v55 = vmul.f32 %v2609_v13, %v2631_v28  ;;  %v528_v2 = vmul.f32 %v2609_v13, %v2645_v38 }
  0x82   :  { %v462_v18 = vpop.permute.xlu0 %461  ;;  %v2627_v26 = vpop.permute.xlu1 %539 }
  0x83   :  { %v465_v23 = vmul.f32 %v462_v18, %v2613_v15  ;;  %v464_v25 = vmul.f32 %v462_v18, %v2617_v12  ;;  %v467_v31 = vmul.f32 %v462_v18, %v2619_v17  ;;  %v466_v32 = vmul.f32 %v462_v18, %v2621_v20 }
  0x84   :  { %v469_v42 = vmul.f32 %v462_v18, %v2635_v33  ;;  %v468_v43 = vmul.f32 %v462_v18, %v2637_v34  ;;  %v543_v51 = vmul.f32 %v2627_v26, %v2613_v15  ;;  %v542_v52 = vmul.f32 %v2627_v26, %v2617_v12 }
  0x85   :  { %v471_v29 = vadd.f32 %v465_v23, %v455_v21  ;;  %v470_v30 = vadd.f32 %v464_v25, %v454_v24  ;;  %v473_v40 = vadd.f32 %v467_v31, %v457_v35  ;;  %v472_v41 = vadd.f32 %v466_v32, %v456_v36 }
  0x86   :  { %v475_v49 = vadd.f32 %v469_v42, %v459_v44  ;;  %v474_v50 = vadd.f32 %v468_v43, %v458_v45  ;;  %v550_v56 = vadd.f32 %v543_v51, %v525_v46  ;;  %v549_v57 = vadd.f32 %v542_v52, %v524_v47 }
  0x87   :  { %484 = vrot.lane.b32.xlu0 %v471_v29, %s2444_s27  ;;  %482 = vrot.lane.b32.xlu1 %v470_v30, %s2444_s27  ;;  %v2647_v39 = vpop.permute.xlu1 %627  ;;  %v2667_v53 = vpop.permute.xlu0 %638  ;;  %v545_v58 = vmul.f32 %v2627_v26, %v2619_v17  ;;  %v544_v59 = vmul.f32 %v2627_v26, %v2621_v20  ;;  %v546_v3 = vmul.f32 %v2627_v26, %v2637_v34 }
  0x88   :  { %v630_v61 = vmul.f32 %v2647_v39, %v2615_v10  ;;  %v641_v62 = vmul.f32 %v2667_v53, %v2617_v12  ;;  %v632_v7 = vmul.f32 %v2647_v39, %v2631_v28  ;;  %v643_v8 = vmul.f32 %v2667_v53, %v2621_v20 }
  0x89   :  { %v552_v63 = vadd.f32 %v545_v58, %v527_v54  ;;  %v551_v0 = vadd.f32 %v544_v59, %v526_v55  ;;  %v553_v9 = vadd.f32 %v546_v3, %v528_v2  ;;  %v631_v11 = vmul.f32 %v2647_v39, %v2611_v14 }
  0x8a   :  { %v648_v6 = vadd.f32 %v641_v62, %v630_v61  ;;  %v642_v18 = vmul.f32 %v2667_v53, %v2613_v15  ;;  %v650_v23 = vadd.f32 %v643_v8, %v632_v7  ;;  %v634_v24 = vmul.f32 %v2647_v39, %v2645_v38 }
  0x8b   :  { %488 = vrot.lane.b32.xlu0 %v473_v40, %s2444_s27  ;;  %486 = vrot.lane.b32.xlu1 %v472_v41, %s2444_s27  ;;  %v645_v29 = vmul.f32 %v2667_v53, %v2637_v34  ;;  %v633_v30 = vmul.f32 %v2647_v39, %v2629_v27  ;;  %v644_v31 = vmul.f32 %v2667_v53, %v2619_v17 }
  0x8c   :  { %v2659_v48 = vpop.permute.xlu1 %697  ;;  %v649_v25 = vadd.f32 %v642_v18, %v631_v11  ;;  %v2713_v32 = vpop.permute.xlu0 %280  ;;  %v635_v35 = vmul.f32 %v2647_v39, %v2643_v37  ;;  %v529_v36 = vmul.f32 %v2609_v13, %v2643_v37  ;;  %v646_v43 = vmul.f32 %v2667_v53, %v2635_v33 }
  0x8d   :  { %v652_v41 = vadd.f32 %v645_v29, %v634_v24  ;;  %v651_v42 = vadd.f32 %v644_v31, %v633_v30  ;;  %v547_v44 = vmul.f32 %v2627_v26, %v2635_v33  ;;  %v701_v46 = vmul.f32 %v2659_v48, %v2611_v14 }
  0x8e   :  { %v700_v47 = vmul.f32 %v2659_v48, %v2615_v10  ;;  %v704_v18 = vmul.f32 %v2659_v48, %v2645_v38 }
  0x8f   :  { %492 = vrot.lane.b32.xlu0 %v475_v49, %s2444_s27  ;;  %490 = vrot.lane.b32.xlu1 %v474_v50, %s2444_s27  ;;  %v653_v49 = vadd.f32 %v646_v43, %v635_v35  ;;  %v554_v50 = vadd.f32 %v547_v44, %v529_v36  ;;  %v284_v43 = vmul.f32 %v2713_v32, %v2615_v10  ;;  %v2787_v44 = vld [vmem:[#allocation3] sm:$0xff] }
  0x91   :  { %v2677_v60 = vpop.permute.xlu1 %708  ;;  %v2727_v45 = vpop.permute.xlu0 %433 }
  0x92   :  { %v712_v51 = vmul.f32 %v2677_v60, %v2613_v15  ;;  %v711_v52 = vmul.f32 %v2677_v60, %v2617_v12  ;;  %v714_v61 = vmul.f32 %v2677_v60, %v2619_v17  ;;  %v713_v62 = vmul.f32 %v2677_v60, %v2621_v20 }
  0x93   :  { %565 = vrot.lane.b32.xlu0 %v550_v56, %s2445_s28  ;;  %563 = vrot.lane.b32.xlu1 %v549_v57, %s2445_s28  ;;  %v703_v56 = vmul.f32 %v2659_v48, %v2629_v27  ;;  %v702_v57 = vmul.f32 %v2659_v48, %v2631_v28  ;;  %v716_v30 = vmul.f32 %v2677_v60, %v2635_v33 }
  0x94   :  { %v719_v58 = vadd.f32 %v712_v51, %v701_v46  ;;  %v718_v59 = vadd.f32 %v711_v52, %v700_v47  ;;  %v285_v51 = vmul.f32 %v2713_v32, %v2611_v14 }
  0x95   :  { %v720_v11 = vadd.f32 %v713_v62, %v702_v57  ;;  %v287_v62 = vmul.f32 %v2713_v32, %v2629_v27 }
  0x96   :  { %v2689_v5 = vpop.permute.xlu1 %291  ;;  %v2743_v55 = vpop.permute.xlu0 %598 }
  0x97   :  { %569 = vrot.lane.b32.xlu0 %v552_v63, %s2445_s28  ;;  %567 = vrot.lane.b32.xlu1 %v551_v0, %s2445_s28  ;;  %v519_v63 = vld [vmem:[#allocation2 + $0x38] sm:$0xff]  ;;  %v294_v47 = vmul.f32 %v2689_v5, %v2787_v44  ;;  %v296_v52 = vmul.f32 %v2689_v5, %v2613_v15 }
  0x98   :  { %v537_v0 = vld [vmem:[#allocation3 + $0x38] sm:$0xff]  ;;  %v607_v3 = vmul.f32 %v2743_v55, %v519_v63 }
  0x99   :  { %v548_v7 = vmul.f32 %v2627_v26, %v537_v0  ;;  %v636_v26 = vmul.f32 %v2647_v39, %v519_v63  ;;  %v647_v31 = vmul.f32 %v2667_v53, %v537_v0  ;;  %v2781_v39 = vld [vmem:[#allocation2 + $0x30] sm:$0xff]  ;;  %v295_v53 = vmul.f32 %v2689_v5, %v2617_v12 }
  0x9b   :  { %662 = vrot.lane.b32.xlu0 %v648_v6, %s2444_s27  ;;  %571 = vrot.lane.b32.xlu1 %v553_v9, %s2445_s28  ;;  %v2703_v21 = vpop.permute.xlu1 %422  ;;  %v530_v6 = vmul.f32 %v2609_v13, %v519_v63  ;;  %v721_v9 = vadd.f32 %v714_v61, %v703_v56  ;;  %v705_v13 = vmul.f32 %v2659_v48, %v2643_v37 }
  0x9c   :  { %v654_v36 = vadd.f32 %v647_v31, %v636_v26  ;;  %v288_v56 = vmul.f32 %v2713_v32, %v2645_v38  ;;  %v303_v61 = vadd.f32 %v296_v52, %v285_v51  ;;  %v300_v26 = vmul.f32 %v2689_v5, %v2635_v33 }
  0x9d   :  { %v723_v35 = vadd.f32 %v716_v30, %v705_v13  ;;  %v289_v13 = vmul.f32 %v2713_v32, %v2643_v37  ;;  %v436_v51 = vmul.f32 %v2727_v45, %v2787_v44 }
  0x9f   :  { %666 = vrot.lane.b32.xlu0 %v650_v23, %s2444_s27  ;;  %664 = vrot.lane.b32.xlu1 %v649_v25, %s2444_s27  ;;  %v715_v23 = vmul.f32 %v2677_v60, %v2637_v34  ;;  %v555_v25 = vadd.f32 %v548_v7, %v530_v6  ;;  %v307_v31 = vadd.f32 %v300_v26, %v289_v13 }
  0xa0   :  { %v2721_v40 = vpop.permute.xlu1 %351 }
  0xa1   :  { %v722_v29 = vadd.f32 %v715_v23, %v704_v18  ;;  %v354_v7 = vmul.f32 %v2721_v40, %v2781_v39  ;;  %v356_v23 = vmul.f32 %v2721_v40, %v2611_v14 }
  0xa3   :  { %670 = vrot.lane.b32.xlu0 %v652_v41, %s2444_s27  ;;  %668 = vrot.lane.b32.xlu1 %v651_v42, %s2444_s27  ;;  %v706_v41 = vmul.f32 %v2659_v48, %v519_v63  ;;  %v717_v42 = vmul.f32 %v2677_v60, %v537_v0  ;;  %v283_v48 = vmul.f32 %v2713_v32, %v2781_v39 }
  0xa4   :  { %v286_v60 = vmul.f32 %v2713_v32, %v2631_v28  ;;  %v298_v63 = vmul.f32 %v2689_v5, %v2619_v17 }
  0xa5   :  { %v2739_v54 = vpop.permute.xlu1 %362  ;;  %v724_v46 = vadd.f32 %v717_v42, %v706_v41  ;;  %v301_v57 = vadd.f32 %v294_v47, %v283_v48  ;;  %v359_v41 = vmul.f32 %v2721_v40, %v2645_v38 }
  0xa6   :  { %v305_v6 = vadd.f32 %v298_v63, %v287_v62  ;;  %v368_v18 = vmul.f32 %v2739_v54, %v2621_v20  ;;  %v369_v32 = vmul.f32 %v2739_v54, %v2619_v17  ;;  %v370_v42 = vmul.f32 %v2739_v54, %v2637_v34 }
  0xa7   :  { %672 = vrot.lane.b32.xlu0 %v653_v49, %s2444_s27  ;;  %573 = vrot.lane.b32.xlu1 %v554_v50, %s2445_s28  ;;  %v302_v49 = vadd.f32 %v295_v53, %v284_v43  ;;  %v297_v50 = vmul.f32 %v2689_v5, %v2621_v20  ;;  %v360_v53 = vmul.f32 %v2721_v40, %v2643_v37 }
  0xa8   :  { %v377_v43 = vadd.f32 %v370_v42, %v359_v41 }
  0xaa   :  { %v2753_v2 = vpop.permute.xlu1 %609 }
  0xab   :  { %734 = vrot.lane.b32.xlu0 %v719_v58, %s2445_s28  ;;  %732 = vrot.lane.b32.xlu1 %v718_v59, %s2445_s28  ;;  %v618_v8 = vmul.f32 %v2753_v2, %v537_v0  ;;  %v304_v58 = vadd.f32 %v297_v50, %v286_v60  ;;  %v299_v59 = vmul.f32 %v2689_v5, %v2637_v34 }
  0xad   :  { %v2765_v24 = vadd.f32 %v618_v8, %v607_v3  ;;  %v306_v0 = vadd.f32 %v299_v59, %v288_v56  ;;  %v366_v3 = vmul.f32 %v2739_v54, %v2617_v12  ;;  %v357_v8 = vmul.f32 %v2721_v40, %v2631_v28 }
  0xaf   :  { %738 = vrot.lane.b32.xlu0 %v721_v9, %s2445_s28  ;;  %736 = vrot.lane.b32.xlu1 %v720_v11, %s2445_s28  ;;  %v365_v9 = vmul.f32 %v2739_v54, %v2787_v44  ;;  %v375_v30 = vadd.f32 %v368_v18, %v357_v8 }
  0xb3   :  { %575 = vrot.lane.b32.xlu0 %v555_v25, %s2445_s28  ;;  %740 = vrot.lane.b32.xlu1 %v722_v29, %s2445_s28  ;;  %v372_v25 = vadd.f32 %v365_v9, %v354_v7  ;;  %v367_v29 = vmul.f32 %v2739_v54, %v2613_v15 }
  0xb7   :  { %742 = vrot.lane.b32.xlu0 %v723_v35, %s2445_s28  ;;  %674 = vrot.lane.b32.xlu1 %v654_v36, %s2444_s27  ;;  %v374_v35 = vadd.f32 %v367_v29, %v356_v23  ;;  %v358_v36 = vmul.f32 %v2721_v40, %v2629_v27 }
  0xb9   :  { %v376_v5 = vadd.f32 %v369_v32, %v358_v36  ;;  %v430_v32 = vmul.f32 %v2703_v21, %v2645_v38 }
  0xbb   :  { %744 = vrot.lane.b32.xlu1 %v724_v46, %s2445_s28  ;;  %244 = vperm.xlu0 %2394, %v2493_v1   ;;  %v371_v46 = vmul.f32 %v2739_v54, %v2635_v33 }
  0xbd   :  { %v378_v48 = vadd.f32 %v371_v46, %v360_v53 }
  0xbf   :  { %262 = vperm.xlu1 %2395, %v2493_v1   ;;  %317 = vrot.lane.b32.xlu0 %v302_v49, %s2444_s27  ;;  %v355_v1 = vmul.f32 %v2721_v40, %v2615_v10  ;;  %v425_v40 = vmul.f32 %v2703_v21, %v2781_v39 }
  0xc1   :  { %v373_v11 = vadd.f32 %v366_v3, %v355_v1  ;;  %v443_v56 = vadd.f32 %v436_v51, %v425_v40  ;;  %v429_v3 = vmul.f32 %v2703_v21, %v2629_v27 }
  0xc3   :  { %315 = vrot.lane.b32.xlu1 %v301_v57, %s2444_s27  ;;  %321 = vrot.lane.b32.xlu0 %v304_v58, %s2444_s27  ;;  %v427_v57 = vmul.f32 %v2703_v21, %v2611_v14  ;;  %v438_v58 = vmul.f32 %v2727_v45, %v2613_v15 }
  0xc5   :  { %v445_v1 = vadd.f32 %v438_v58, %v427_v57  ;;  %v613_v57 = vmul.f32 %v2753_v2, %v2613_v15 }
  0xc7   :  { %319 = vrot.lane.b32.xlu1 %v303_v61, %s2444_s27  ;;  %325 = vrot.lane.b32.xlu0 %v306_v0, %s2444_s27 }
  0xcb   :  { %323 = vrot.lane.b32.xlu1 %v305_v6, %s2444_s27  ;;  %388 = vrot.lane.b32.xlu0 %v373_v11, %s2445_s28  ;;  %v440_v6 = vmul.f32 %v2727_v45, %v2619_v17 }
  0xcd   :  { %v447_v23 = vadd.f32 %v440_v6, %v429_v3  ;;  %v604_v6 = vmul.f32 %v2743_v55, %v2629_v27 }
  0xcf   :  { %386 = vrot.lane.b32.xlu1 %v372_v25, %s2445_s28  ;;  %392 = vrot.lane.b32.xlu0 %v375_v30, %s2445_s28 }
  0xd3   :  { %390 = vrot.lane.b32.xlu1 %v374_v35, %s2445_s28  ;;  %327 = vrot.lane.b32.xlu0 %v307_v31, %s2444_s27 }
  0xd7   :  { %394 = vrot.lane.b32.xlu1 %v376_v5, %s2445_s28  ;;  %v441_v5 = vmul.f32 %v2727_v45, %v2637_v34 }
  0xd9   :  { %v448_v53 = vadd.f32 %v441_v5, %v430_v32  ;;  %v605_v5 = vmul.f32 %v2743_v55, %v2645_v38 }
  0xdb   :  { %396 = vrot.lane.b32.xlu1 %v377_v43, %s2445_s28 }
  0xdf   :  { %398 = vrot.lane.b32.xlu1 %v378_v48, %s2445_s28 }
  0xf9   :  { %v2858_v60 = vpop.permute.xlu0 %484  ;;  %v2860_v47 = vpop.permute.xlu1 %482 }
  0xfa   :  { %v506_v59 = vadd.f32 %v2860_v47, %v443_v56  ;;  %v602_v56 = vmul.f32 %v2743_v55, %v2611_v14 }
  0xfc   :  { %v620_v3 = vadd.f32 %v613_v57, %v602_v56 }
  0xfd   :  { %v2862_v49 = vpop.permute.xlu0 %488  ;;  %v2864_v50 = vpop.permute.xlu1 %486 }
  0xfe   :  { %v495_v63 = vsel %vm329_vm0, %v2858_v60, %v2864_v50 }
  0xff   :  { %v508_v7 = vadd.f32 %v495_v63, %v445_v1 }
 0x101   :  { %v2870_v54 = vpop.permute.xlu0 %492  ;;  %v491_v52 = vpop.permute.xlu1 %490 }
 0x102   :  { %v497_v11 = vsel %vm329_vm0, %v2862_v49, %v491_v52  ;;  %v498_v43 = vsel %vm329_vm0, %v491_v52, %v2870_v54  ;;  %v431_v52 = vmul.f32 %v2703_v21, %v2643_v37 }
 0x103   :  { %v510_v26 = vadd.f32 %v497_v11, %v447_v23  ;;  %v511_v46 = vadd.f32 %v498_v43, %v448_v53  ;;  %v437_v11 = vmul.f32 %v2727_v45, %v2617_v12  ;;  %v616_v43 = vmul.f32 %v2753_v2, %v2637_v34 }
 0x105   :  { %v2877_v61 = vpop.permute.xlu0 %565  ;;  %v2879_v62 = vpop.permute.xlu1 %563 }
 0x106   :  { %v590_v0 = vadd.f32 %v2879_v62, %v506_v59 }
 0x108   :  { %773 = vrot.lane.b32.xlu0 %v590_v0, %s2446_s29  ;;  %v442_v0 = vmul.f32 %v2727_v45, %v2635_v33 }
 0x109   :  { %v2890_v8 = vpop.permute.xlu0 %569  ;;  %v2892_v9 = vpop.permute.xlu1 %567 }
 0x10a   :  { %v578_v18 = vsel %vm400_vm1, %v2877_v61, %v2892_v9 }
 0x10b   :  { %v592_v13 = vadd.f32 %v578_v18, %v508_v7  ;;  %v615_v7 = vmul.f32 %v2753_v2, %v2619_v17 }
 0x10d   :  { %v2899_v25 = vpop.permute.xlu0 %662  ;;  %v572_v29 = vpop.permute.xlu1 %571  ;;  %777 = vrot.lane.b32.xlu0 %v592_v13, %s2446_s29  ;;  %v622_v32 = vadd.f32 %v615_v7, %v604_v6  ;;  %v623_v6 = vadd.f32 %v616_v43, %v605_v5 }
 0x10e   :  { %v580_v30 = vsel %vm400_vm1, %v2890_v8, %v572_v29 }
 0x10f   :  { %v594_v31 = vadd.f32 %v580_v30, %v510_v26  ;;  %v426_v26 = vmul.f32 %v2703_v21, %v2615_v10 }
 0x111   :  { %v2904_v35 = vpop.permute.xlu0 %666  ;;  %v2906_v36 = vpop.permute.xlu1 %664  ;;  %781 = vrot.lane.b32.xlu0 %v594_v31, %s2446_s29 }
 0x112   :  { %v677_v1 = vsel %vm329_vm0, %v2906_v36, %v2904_v35 }
 0x113   :  { %v690_v18 = vadd.f32 %v677_v1, %v620_v3 }
 0x115   :  { %v671_v41 = vpop.permute.xlu0 %670  ;;  %v2913_v42 = vpop.permute.xlu1 %668 }
 0x116   :  { %v679_v30 = vsel %vm329_vm0, %v2913_v42, %v671_v41 }
 0x117   :  { %v692_v57 = vadd.f32 %v679_v30, %v622_v32 }
 0x119   :  { %v2917_v48 = vpop.permute.xlu0 %672  ;;  %v574_v51 = vpop.permute.xlu1 %573 }
 0x11a   :  { %v581_v40 = vsel %vm400_vm1, %v572_v29, %v574_v51  ;;  %v449_v29 = vadd.f32 %v442_v0, %v431_v52  ;;  %v494_v0 = vsel %vm329_vm0, %v2860_v47, %v2858_v60  ;;  %v680_v1 = vsel %vm329_vm0, %v671_v41, %v2917_v48 }
 0x11b   :  { %v595_v58 = vadd.f32 %v581_v40, %v511_v46  ;;  %v428_v46 = vmul.f32 %v2703_v21, %v2631_v28  ;;  %v439_v40 = vmul.f32 %v2727_v45, %v2621_v20  ;;  %v444_v45 = vadd.f32 %v437_v11, %v426_v26 }
 0x11c   :  { %v512_v56 = vadd.f32 %v2870_v54, %v449_v29  ;;  %v693_v30 = vadd.f32 %v680_v1, %v623_v6  ;;  %v496_v47 = vsel %vm329_vm0, %v2864_v50, %v2862_v49  ;;  %v579_v26 = vsel %vm400_vm1, %v2892_v9, %v2890_v8 }
 0x11d   :  { %v2924_v59 = vpop.permute.xlu0 %734  ;;  %v2926_v63 = vpop.permute.xlu1 %732  ;;  %783 = vrot.lane.b32.xlu0 %v595_v58, %s2446_s29  ;;  %v507_v29 = vadd.f32 %v494_v0, %v444_v45  ;;  %v446_v60 = vadd.f32 %v439_v40, %v428_v46  ;;  %v676_v49 = vsel %vm329_vm0, %v2899_v25, %v2906_v36  ;;  %v603_v40 = vmul.f32 %v2743_v55, %v2631_v28 }
 0x11e   :  { %v614_v8 = vmul.f32 %v2753_v2, %v2621_v20  ;;  %v678_v25 = vsel %vm329_vm0, %v2904_v35, %v2913_v42 }
 0x11f   :  { %v509_v43 = vadd.f32 %v496_v47, %v446_v60 }
 0x120   :  { %v621_v36 = vadd.f32 %v614_v8, %v603_v40 }
 0x121   :  { %v739_v23 = vpop.permute.xlu0 %738  ;;  %v737_v13 = vpop.permute.xlu1 %736  ;;  %v593_v9 = vadd.f32 %v579_v26, %v509_v43 }
 0x122   :  { %v747_v31 = vsel %vm400_vm1, %v2924_v59, %v737_v13  ;;  %v748_v0 = vsel %vm400_vm1, %v737_v13, %v739_v23 }
 0x123   :  { %v760_v53 = vadd.f32 %v747_v31, %v690_v18  ;;  %v577_v18 = vsel %vm400_vm1, %v2879_v62, %v2877_v61  ;;  %v612_v61 = vmul.f32 %v2753_v2, %v2617_v12 }
 0x124   :  { %v591_v11 = vadd.f32 %v577_v18, %v507_v29 }
 0x125   :  { %v576_v58 = vpop.permute.xlu0 %575  ;;  %v741_v52 = vpop.permute.xlu1 %740  ;;  %817 = vrot.lane.b32.xlu0 %v760_v53, %s2447_s30 }
 0x126   :  { %v582_v21 = vsel %vm400_vm1, %v574_v51, %v576_v58  ;;  %v749_v3 = vsel %vm400_vm1, %v739_v23, %v741_v52  ;;  %v601_v51 = vmul.f32 %v2743_v55, %v2615_v10  ;;  %v606_v58 = vmul.f32 %v2743_v55, %v2643_v37 }
 0x127   :  { %v596_v54 = vadd.f32 %v582_v21, %v512_v56  ;;  %v762_v7 = vadd.f32 %v749_v3, %v692_v57  ;;  %v2448_v3 = vmov 36  }
 0x128   :  { %v619_v46 = vadd.f32 %v612_v61, %v601_v51  ;;  %2396 = vset.pattern.permute.xlu0 %v2448_v3 }
 0x129   :  { %v743_v31 = vpop.permute.xlu0 %742  ;;  %v675_v32 = vpop.permute.xlu1 %674  ;;  %821 = vrot.lane.b32.xlu0 %v762_v7, %s2447_s30  ;;  %785 = vrot.lane.b32.xlu1 %v596_v54, %s2446_s29 }
 0x12a   :  { %v750_v41 = vsel %vm400_vm1, %v741_v52, %v743_v31  ;;  %v695_v5 = vadd.f32 %v675_v32, %v2765_v24  ;;  %v746_v24 = vsel %vm400_vm1, %v2926_v63, %v2924_v59  ;;  %v689_v56 = vadd.f32 %v676_v49, %v619_v46 }
 0x12b   :  { %v763_v62 = vadd.f32 %v750_v41, %v693_v30  ;;  %v617_v52 = vmul.f32 %v2753_v2, %v2635_v33  ;;  %v691_v59 = vadd.f32 %v678_v25, %v621_v36  ;;  %v681_v63 = vsel %vm329_vm0, %v2917_v48, %v675_v32 }
 0x12c   :  { %v759_v57 = vadd.f32 %v746_v24, %v689_v56 }
 0x12d   :  { %v745_v53 = vpop.permute.xlu1 %744  ;;  %823 = vrot.lane.b32.xlu0 %v763_v62, %s2447_s30  ;;  %775 = vrot.lane.b32.xlu1 %v591_v11, %s2446_s29  ;;  %v624_v1 = vadd.f32 %v617_v52, %v606_v58  ;;  %v761_v21 = vadd.f32 %v748_v0, %v691_v59 }
 0x12e   :  { %v765_v50 = vadd.f32 %v745_v53, %v695_v5  ;;  %v751_v35 = vsel %vm400_vm1, %v743_v31, %v745_v53 }
 0x12f   :  { %v694_v42 = vadd.f32 %v681_v63, %v624_v1 }
 0x131   :  { %827 = vrot.lane.b32.xlu0 %v765_v50, %s2447_s30  ;;  %779 = vrot.lane.b32.xlu1 %v593_v9, %s2446_s29  ;;  %v764_v55 = vadd.f32 %v751_v35, %v694_v42 }
 0x135   :  { %815 = vrot.lane.b32.xlu1 %v759_v57, %s2447_s30 }
 0x136   :  { %v245_v2 = vpop.permute.xlu0 %244 }
 0x137   :  { %v247_v26 = vmul.f32 %v245_v2, %v2781_v39  ;;  %v248_v43 = vmul.f32 %v245_v2, %v2615_v10  ;;  %v249_v46 = vmul.f32 %v245_v2, %v2611_v14  ;;  %v250_v40 = vmul.f32 %v245_v2, %v2631_v28 }
 0x138   :  { %v251_v10 = vmul.f32 %v245_v2, %v2629_v27  ;;  %v252_v14 = vmul.f32 %v245_v2, %v2645_v38  ;;  %v253_v59 = vmul.f32 %v245_v2, %v2643_v37 }
 0x139   :  { %819 = vrot.lane.b32.xlu1 %v761_v21, %s2447_s30 }
 0x13a   :  { %v263_v23 = vpop.permute.xlu1 %262  ;;  %v318_v13 = vpop.permute.xlu0 %317 }
 0x13b   :  { %v265_v11 = vmul.f32 %v263_v23, %v2787_v44  ;;  %v266_v5 = vmul.f32 %v263_v23, %v2617_v12  ;;  %v267_v44 = vmul.f32 %v263_v23, %v2613_v15  ;;  %v268_v39 = vmul.f32 %v263_v23, %v2621_v20 }
 0x13c   :  { %v269_v24 = vmul.f32 %v263_v23, %v2619_v17  ;;  %v270_v28 = vmul.f32 %v263_v23, %v2637_v34  ;;  %v271_v63 = vmul.f32 %v263_v23, %v2635_v33 }
 0x13d   :  { %825 = vrot.lane.b32.xlu1 %v764_v55, %s2447_s30  ;;  %v272_v50 = vadd.f32 %v265_v11, %v247_v26  ;;  %v273_v8 = vadd.f32 %v266_v5, %v248_v43  ;;  %v274_v58 = vadd.f32 %v267_v44, %v249_v46  ;;  %v275_v52 = vadd.f32 %v268_v39, %v250_v40 }
 0x13e   :  { %v316_v45 = vpop.permute.xlu1 %315  ;;  %v322_v6 = vpop.permute.xlu0 %321  ;;  %v276_v17 = vadd.f32 %v269_v24, %v251_v10 }
 0x13f   :  { %v330_v9 = vsel %vm329_vm0, %v316_v45, %v318_v13 }
 0x140   :  { %v343_v36 = vadd.f32 %v330_v9, %v272_v50 }
 0x142   :  { %v320_v54 = vpop.permute.xlu1 %319  ;;  %v326_v7 = vpop.permute.xlu0 %325 }
 0x143   :  { %v331_v12 = vsel %vm329_vm0, %v318_v13, %v320_v54  ;;  %v332_v20 = vsel %vm329_vm0, %v320_v54, %v322_v6  ;;  %v277_v13 = vadd.f32 %v270_v28, %v252_v14  ;;  %v278_v54 = vadd.f32 %v271_v63, %v253_v59  ;;  %v14_v59 = vld [vmem:[%s3995_s0 + $0x18] sm:$0xf0] }
 0x144   :  { %v344_v57 = vadd.f32 %v331_v12, %v273_v8  ;;  %v345_v42 = vadd.f32 %v332_v20, %v274_v58  ;;  %v13_v20 = vld [vmem:[%s3995_s0 + $0x10] sm:$0xf0]  ;;  %v947_v63 = vrot.slane %v14_v59, 4 }
 0x146   :  { %v324_v48 = vpop.permute.xlu1 %323  ;;  %v389_v18 = vpop.permute.xlu0 %388 }
 0x147   :  { %v333_v0 = vsel %vm329_vm0, %v322_v6, %v324_v48  ;;  %v334_v1 = vsel %vm329_vm0, %v324_v48, %v326_v7 }
 0x148   :  { %v346_v3 = vadd.f32 %v333_v0, %v275_v52  ;;  %v347_v23 = vadd.f32 %v334_v1, %v276_v17 }
 0x14a   :  { %v387_v29 = vpop.permute.xlu1 %386  ;;  %v393_v30 = vpop.permute.xlu0 %392 }
 0x14b   :  { %v401_v15 = vsel %vm400_vm1, %v387_v29, %v389_v18 }
 0x14c   :  { %v414_v21 = vadd.f32 %v401_v15, %v343_v36 }
 0x14e   :  { %v391_v31 = vpop.permute.xlu1 %390  ;;  %v3010_v32 = vpop.permute.xlu0 %327 }
 0x14f   :  { %v402_v27 = vsel %vm400_vm1, %v389_v18, %v391_v31  ;;  %v403_v6 = vsel %vm400_vm1, %v391_v31, %v393_v30  ;;  %v335_v33 = vsel %vm329_vm0, %v326_v7, %v3010_v32  ;;  %v349_v50 = vadd.f32 %v3010_v32, %v278_v54 }
 0x150   :  { %v415_v55 = vadd.f32 %v402_v27, %v344_v57  ;;  %v416_v26 = vadd.f32 %v403_v6, %v345_v42  ;;  %v348_v5 = vadd.f32 %v335_v33, %v277_v13  ;;  %v946_v27 = vrot.slane %v13_v20, 4 }
 0x152   :  { %v3012_v60 = vpop.permute.xlu1 %394 }
 0x153   :  { %v404_v37 = vsel %vm400_vm1, %v393_v30, %v3012_v60 }
 0x154   :  { %v417_v30 = vadd.f32 %v404_v37, %v346_v3 }
 0x156   :  { %v3014_v41 = vpop.permute.xlu1 %396 }
 0x157   :  { %v405_v7 = vsel %vm400_vm1, %v3012_v60, %v3014_v41 }
 0x158   :  { %v418_v32 = vadd.f32 %v405_v7, %v347_v23  ;;  %v15_v23 = vld [vmem:[%s3995_s0 + $0x20] sm:$0xf0] }
 0x15a   :  { %v3016_v61 = vpop.permute.xlu1 %398 }
 0x17a   :  { %v774_v47 = vpop.permute.xlu0 %773 }
 0x17f   :  { %v778_v51 = vpop.permute.xlu0 %777 }
 0x183   :  { %v3018_v62 = vpop.permute.xlu0 %781 }
 0x18f   :  { %v3024_v53 = vpop.permute.xlu0 %783 }
 0x190   :  { %v792_v60 = vsel %vm787_vm2, %v3018_v62, %v3024_v53 }
 0x191   :  { %v805_v36 = vadd.f32 %v792_v60, %v418_v32 }
 0x197   :  { %v818_v56 = vpop.permute.xlu0 %817 }
 0x19b   :  { %v3026_v49 = vpop.permute.xlu1 %785  ;;  %v822_v45 = vpop.permute.xlu0 %821 }
 0x19f   :  { %v776_v25 = vpop.permute.xlu1 %775  ;;  %v824_v46 = vpop.permute.xlu0 %823 }
 0x1a0   :  { %v788_v38 = vsel %vm787_vm2, %v774_v47, %v776_v25  ;;  %v789_v35 = vsel %vm787_vm2, %v776_v25, %v778_v51  ;;  %v833_v25 = vsel %vm829_vm3, %v822_v45, %v824_v46 }
 0x1a1   :  { %v801_v2 = vadd.f32 %v788_v38, %v414_v21  ;;  %v802_v48 = vadd.f32 %v789_v35, %v415_v55  ;;  %v3092_v58 = vadd.f32 %v833_v25, %v805_v36 }
 0x1a3   :  { %v780_v34 = vpop.permute.xlu1 %779  ;;  %v828_v28 = vpop.permute.xlu0 %827 }
 0x1a4   :  { %v790_v29 = vsel %vm787_vm2, %v778_v51, %v780_v34  ;;  %v791_v47 = vsel %vm787_vm2, %v780_v34, %v3018_v62  ;;  %v406_v51 = vsel %vm400_vm1, %v3014_v41, %v3016_v61  ;;  %v793_v41 = vsel %vm787_vm2, %v3024_v53, %v3026_v49 }
 0x1a5   :  { %v803_v40 = vadd.f32 %v790_v29, %v416_v26  ;;  %v804_v8 = vadd.f32 %v791_v47, %v417_v30  ;;  %v419_v12 = vadd.f32 %v406_v51, %v348_v5  ;;  %v948_v29 = vrot.slane %v15_v23, 4  ;;  %v17_v26 = vld [vmem:[%s3995_s0 + $0x30] sm:$0xf0] }
 0x1a6   :  { %v950_v7 = vrot.slane %v17_v26, 4 }
 0x1a7   :  { %v816_v18 = vpop.permute.xlu1 %815  ;;  %v806_v14 = vadd.f32 %v793_v41, %v419_v12 }
 0x1a8   :  { %v830_v11 = vsel %vm829_vm3, %v816_v18, %v818_v56  ;;  %v3056_v31 = vadd.f32 %v816_v18, %v801_v2 }
 0x1a9   :  { %v3058_v43 = vadd.f32 %v830_v11, %v802_v48  ;;  %v16_v11 = vld [vmem:[%s3995_s0 + $0x28] sm:$0xf0] }
 0x1aa   :  { %857 = vrot.lane.b32.xlu1 %v3056_v31, %s2449_s3  ;;  %v949_v5 = vrot.slane %v16_v11, 4 }
 0x1ab   :  { %859 = vrot.lane.b32.xlu0 %v3058_v43, %s2449_s3  ;;  %v820_v9 = vpop.permute.xlu1 %819 }
 0x1ac   :  { %v831_v44 = vsel %vm829_vm3, %v818_v56, %v820_v9  ;;  %v832_v39 = vsel %vm829_vm3, %v820_v9, %v822_v45  ;;  %v420_v56 = vadd.f32 %v3016_v61, %v349_v50  ;;  %v12_v61 = vld [vmem:[%s3995_s0 + $0x8] sm:$0xf0] }
 0x1ad   :  { %v3079_v10 = vadd.f32 %v832_v39, %v804_v8  ;;  %v3081_v24 = vadd.f32 %v831_v44, %v803_v40  ;;  %v945_v17 = vrot.slane %v12_v61, 4 }
 0x1ae   :  { %v807_v15 = vadd.f32 %v3026_v49, %v420_v56  ;;  %v3113_v49 = vld [vmem:[%s3994_s1] sm:$0xff] }
 0x1af   :  { %863 = vrot.lane.b32.xlu0 %v3079_v10, %s2449_s3  ;;  %v826_v62 = vpop.permute.xlu1 %825  ;;  %861 = vrot.lane.b32.xlu1 %v3081_v24, %s2449_s3 }
 0x1b0   :  { %v834_v53 = vsel %vm829_vm3, %v824_v46, %v826_v62  ;;  %v835_v52 = vsel %vm829_vm3, %v826_v62, %v828_v28 }
 0x1b1   :  { %v3090_v57 = vadd.f32 %v834_v53, %v806_v14  ;;  %v3106_v0 = vadd.f32 %v835_v52, %v807_v15 }
 0x1b3   :  { %867 = vrot.lane.b32.xlu0 %v3090_v57, %s2449_s3  ;;  %865 = vrot.lane.b32.xlu1 %v3092_v58, %s2449_s3 }
 0x1b7   :  { %869 = vrot.lane.b32.xlu1 %v3106_v0, %s2449_s3  ;;  %929 = vperm.xlu0 %2396, %v3113_v49  }
 0x1bb   :  { %953 = vrot.lane.b32.xlu0 %v946_v27, %s2450_s12  ;;  %951 = vrot.lane.b32.xlu1 %v945_v17, %s2450_s12 }
 0x1bf   :  { %955 = vrot.lane.b32.xlu1 %v947_v63, %s2450_s12 }
 0x21c   :  { %v858_v38 = vpop.permute.xlu1 %857 }
 0x21d   :  { %v860_v34 = vpop.permute.xlu0 %859 }
 0x21e   :  { %v872_v1 = vsel %vm871_vm4, %v858_v38, %v860_v34 }
 0x21f   :  { %v884_v21 = vrot.slane %v872_v1, 4 }
 0x221   :  { %v864_v35 = vpop.permute.xlu0 %863  ;;  %v862_v42 = vpop.permute.xlu1 %861  ;;  %896 = vrot.lane.b32.xlu1 %v884_v21, %s2450_s12 }
 0x222   :  { %v873_v3 = vsel %vm871_vm4, %v860_v34, %v862_v42  ;;  %v874_v55 = vsel %vm871_vm4, %v862_v42, %v864_v35 }
 0x223   :  { %v885_v13 = vrot.slane %v873_v3, 4  ;;  %v886_v45 = vrot.slane %v874_v55, 4 }
 0x225   :  { %v868_v6 = vpop.permute.xlu0 %867  ;;  %v866_v37 = vpop.permute.xlu1 %865  ;;  %900 = vrot.lane.b32.xlu0 %v886_v45, %s2450_s12  ;;  %898 = vrot.lane.b32.xlu1 %v885_v13, %s2450_s12 }
 0x226   :  { %v875_v33 = vsel %vm871_vm4, %v864_v35, %v866_v37  ;;  %v876_v2 = vsel %vm871_vm4, %v866_v37, %v868_v6 }
 0x227   :  { %v887_v54 = vrot.slane %v875_v33, 4  ;;  %v888_v48 = vrot.slane %v876_v2, 4 }
 0x229   :  { %v870_v18 = vpop.permute.xlu1 %869  ;;  %904 = vrot.lane.b32.xlu0 %v888_v48, %s2450_s12  ;;  %902 = vrot.lane.b32.xlu1 %v887_v54, %s2450_s12 }
 0x22a   :  { %v877_v47 = vsel %vm871_vm4, %v868_v6, %v870_v18 }
 0x22b   :  { %v889_v30 = vrot.slane %v877_v47, 4 }
 0x22d   :  { %906 = vrot.lane.b32.xlu0 %v889_v30, %s2450_s12  ;;  %957 = vrot.lane.b32.xlu1 %v948_v29, %s2450_s12  ;;  %v3146_v51 = vpop.permute.xlu1 %951 }
 0x231   :  { %959 = vrot.lane.b32.xlu0 %v949_v5, %s2450_s12  ;;  %961 = vrot.lane.b32.xlu1 %v950_v7, %s2450_s12  ;;  %v956_v46 = vpop.permute.xlu1 %955 }
 0x232   :  { %v930_v50 = vpop.permute.xlu0 %929 }
 0x236   :  { %v954_v40 = vpop.permute.xlu0 %953 }
 0x237   :  { %v3160_v56 = vsel %vm908_vm5, %v3146_v51, %v954_v40  ;;  %v3163_v28 = vsel %vm908_vm5, %v954_v40, %v956_v46 }
 0x293   :  { %v897_v8 = vpop.permute.xlu1 %896 }
 0x294   :  { %v921_v9 = vadd.f32 %v897_v8, %v3056_v31 }
 0x296   :  { %v932_v60 = vadd.f32 %v930_v50, %v921_v9 }
 0x297   :  { %v901_v41 = vpop.permute.xlu0 %900  ;;  %v899_v44 = vpop.permute.xlu1 %898 }
 0x298   :  { %v909_v39 = vsel %vm908_vm5, %v897_v8, %v899_v44  ;;  %v910_v32 = vsel %vm908_vm5, %v899_v44, %v901_v41  ;;  %v3152_v12 = vmul.f32 %v3146_v51, %v932_v60 }
 0x299   :  { %v922_v25 = vadd.f32 %v909_v39, %v3058_v43  ;;  %v923_v36 = vadd.f32 %v910_v32, %v3081_v24 }
 0x29a   :  { %989 = vrot.lane.b32.xlu0 %v3152_v12, %s2449_s3 }
 0x29b   :  { %v933_v14 = vadd.f32 %v930_v50, %v922_v25  ;;  %v905_v31 = vpop.permute.xlu0 %904  ;;  %v903_v62 = vpop.permute.xlu1 %902  ;;  %v934_v53 = vadd.f32 %v930_v50, %v923_v36 }
 0x29c   :  { %v911_v52 = vsel %vm908_vm5, %v901_v41, %v903_v62  ;;  %v912_v43 = vsel %vm908_vm5, %v903_v62, %v905_v31 }
 0x29d   :  { %v924_v24 = vadd.f32 %v911_v52, %v3079_v10  ;;  %v3169_v15 = vmul.f32 %v3163_v28, %v934_v53  ;;  %v3172_v20 = vmul.f32 %v3160_v56, %v933_v14  ;;  %v925_v61 = vadd.f32 %v912_v43, %v3092_v58 }
 0x29e   :  { %v1029_v58 = vmul.f32 %v3152_v12, %v3152_v12 }
 0x29f   :  { %v935_v27 = vadd.f32 %v930_v50, %v924_v24  ;;  %v907_v17 = vpop.permute.xlu0 %906  ;;  %993 = vrot.lane.b32.xlu0 %v3169_v15, %s2449_s3  ;;  %991 = vrot.lane.b32.xlu1 %v3172_v20, %s2449_s3  ;;  %v958_v59 = vpop.permute.xlu1 %957  ;;  %v936_v1 = vadd.f32 %v930_v50, %v925_v61  ;;  %v1031_v55 = vmul.f32 %v3169_v15, %v3169_v15 }
 0x2a0   :  { %v913_v63 = vsel %vm908_vm5, %v905_v31, %v907_v17  ;;  %v3181_v10 = vsel %vm908_vm5, %v956_v46, %v958_v59  ;;  %v927_v45 = vadd.f32 %v907_v17, %v3106_v0  ;;  %v1030_v23 = vmul.f32 %v3172_v20, %v3172_v20 }
 0x2a1   :  { %v926_v38 = vadd.f32 %v913_v63, %v3090_v57  ;;  %v3185_v34 = vmul.f32 %v3181_v10, %v935_v27 }
 0x2a2   :  { %v938_v33 = vadd.f32 %v930_v50, %v927_v45 }
 0x2a3   :  { %v960_v21 = vpop.permute.xlu0 %959  ;;  %1043 = vrot.lane.b32.xlu0 %v1029_v58, %s2449_s3  ;;  %995 = vrot.lane.b32.xlu1 %v3185_v34, %s2449_s3  ;;  %v3192_v35 = vpop.permute.xlu1 %961  ;;  %v937_v3 = vadd.f32 %v930_v50, %v926_v38  ;;  %v1032_v6 = vmul.f32 %v3185_v34, %v3185_v34 }
 0x2a4   :  { %v3195_v42 = vsel %vm908_vm5, %v958_v59, %v960_v21  ;;  %v3204_v13 = vsel %vm908_vm5, %v960_v21, %v3192_v35  ;;  %v3225_v0 = vmul.f32 %v3192_v35, %v938_v33 }
 0x2a5   :  { %v3198_v57 = vmul.f32 %v3195_v42, %v936_v1  ;;  %v3213_v37 = vmul.f32 %v3204_v13, %v937_v3 }
 0x2a6   :  { %v1035_v48 = vmul.f32 %v3225_v0, %v3225_v0 }
 0x2a7   :  { %1047 = vrot.lane.b32.xlu0 %v1031_v55, %s2449_s3  ;;  %997 = vrot.lane.b32.xlu1 %v3198_v57, %s2449_s3  ;;  %v1033_v2 = vmul.f32 %v3198_v57, %v3198_v57  ;;  %v1034_v54 = vmul.f32 %v3213_v37, %v3213_v37 }
 0x2ab   :  { %1049 = vrot.lane.b32.xlu0 %v1032_v6, %s2449_s3  ;;  %999 = vrot.lane.b32.xlu1 %v3213_v37, %s2449_s3 }
 0x2af   :  { %1051 = vrot.lane.b32.xlu0 %v1033_v2, %s2449_s3  ;;  %1045 = vrot.lane.b32.xlu1 %v1030_v23, %s2449_s3 }
 0x2b3   :  { %1001 = vrot.lane.b32.xlu1 %v3225_v0, %s2449_s3  ;;  %1053 = vrot.lane.b32.xlu0 %v1034_v54, %s2449_s3 }
 0x2b7   :  { %1055 = vrot.lane.b32.xlu1 %v1035_v48, %s2449_s3 }
 0x30c   :  { %v990_v18 = vpop.permute.xlu0 %989 }
 0x311   :  { %v994_v29 = vpop.permute.xlu0 %993  ;;  %v992_v47 = vpop.permute.xlu1 %991 }
 0x312   :  { %v1003_v7 = vsel %vm871_vm4, %v990_v18, %v992_v47  ;;  %v1004_v50 = vsel %vm871_vm4, %v992_v47, %v994_v29 }
 0x313   :  { %v1016_v40 = vsel %vm1015_vm6, %v1003_v7, 0.0  ;;  %v1017_v8 = vsel %vm1015_vm6, %v1004_v50, 0.0 }
 0x314   :  { %v1018_v39 = vadd.f32 %v1017_v8, %v1016_v40  ;;  %v2452_v8 = vmov 38  }
 0x315   :  { %v1044_v11 = vpop.permute.xlu0 %1043  ;;  %v996_v26 = vpop.permute.xlu1 %995  ;;  %2398 = vset.pattern.permute.xlu0 %v2452_v8 }
 0x316   :  { %v1005_v46 = vsel %vm871_vm4, %v994_v29, %v996_v26 }
 0x317   :  { %v1019_v44 = vsel %vm1015_vm6, %v1005_v46, 0.0 }
 0x318   :  { %v1020_v31 = vadd.f32 %v1019_v44, %v1018_v39  ;;  %v2454_v44 = vmov 27   ;;  %v2455_v39 = vmov 28  }
 0x319   :  { %v1048_v30 = vpop.permute.xlu0 %1047  ;;  %v998_v5 = vpop.permute.xlu1 %997 }
 0x31a   :  { %v1006_v41 = vsel %vm871_vm4, %v996_v26, %v998_v5 }
 0x31b   :  { %v1021_v25 = vsel %vm1015_vm6, %v1006_v41, 0.0 }
 0x31c   :  { %v1022_v27 = vadd.f32 %v1021_v25, %v1020_v31  ;;  %v2457_v25 = vmov 33   ;;  %v2458_v31 = vmov 26  }
 0x31d   :  { %v1050_v9 = vpop.permute.xlu0 %1049  ;;  %v1000_v60 = vpop.permute.xlu1 %999 }
 0x31e   :  { %v1007_v32 = vsel %vm871_vm4, %v998_v5, %v1000_v60  ;;  %v1059_v62 = vsel %vm871_vm4, %v1048_v30, %v1050_v9 }
 0x31f   :  { %v1023_v43 = vsel %vm1015_vm6, %v1007_v32, 0.0  ;;  %v1072_v63 = vsel %vm1015_vm6, %v1059_v62, 0.0  ;;  %v2456_v32 = vmov 32   ;;  %v2459_v62 = vmov 29  }
 0x320   :  { %v1024_v1 = vadd.f32 %v1023_v43, %v1022_v27 }
 0x321   :  { %v1052_v36 = vpop.permute.xlu0 %1051  ;;  %v1046_v14 = vpop.permute.xlu1 %1045 }
 0x322   :  { %v1057_v53 = vsel %vm871_vm4, %v1044_v11, %v1046_v14  ;;  %v1058_v52 = vsel %vm871_vm4, %v1046_v14, %v1048_v30  ;;  %v1060_v17 = vsel %vm871_vm4, %v1050_v9, %v1052_v36  ;;  %v2451_v11 = vmov 37  }
 0x323   :  { %v1069_v24 = vsel %vm1015_vm6, %v1057_v53, 0.0  ;;  %v1070_v61 = vsel %vm1015_vm6, %v1058_v52, 0.0  ;;  %v1074_v45 = vsel %vm1015_vm6, %v1060_v17, 0.0  ;;  %2397 = vset.pattern.permute.xlu1 %v2451_v11  ;;  %v2460_v53 = vmov 34  }
 0x324   :  { %v1071_v59 = vadd.f32 %v1070_v61, %v1069_v24  ;;  %v2461_v52 = vmov 35  }
 0x325   :  { %v1054_v38 = vpop.permute.xlu0 %1053  ;;  %v1002_v58 = vpop.permute.xlu1 %1001 }
 0x326   :  { %v1073_v21 = vadd.f32 %v1072_v63, %v1071_v59  ;;  %v1061_v3 = vsel %vm871_vm4, %v1052_v36, %v1054_v38  ;;  %v1008_v55 = vsel %vm871_vm4, %v1000_v60, %v1002_v58 }
 0x327   :  { %v1025_v6 = vsel %vm1015_vm6, %v1008_v55, 0.0  ;;  %v1076_v23 = vsel %vm1015_vm6, %v1061_v3, 0.0 }
 0x328   :  { %v1075_v33 = vadd.f32 %v1074_v45, %v1073_v21  ;;  %v1026_v2 = vadd.f32 %v1025_v6, %v1024_v1 }
 0x329   :  { %v1056_v54 = vpop.permute.xlu1 %1055 }
 0x32a   :  { %v1077_v48 = vadd.f32 %v1076_v23, %v1075_v33  ;;  %v1062_v18 = vsel %vm871_vm4, %v1054_v38, %v1056_v54  ;;  %1027 = vadd.xlane.f32.xlu0 %v1026_v2 }
 0x32b   :  { %v1078_v29 = vsel %vm1015_vm6, %v1062_v18, 0.0 }
 0x32c   :  { %v1079_v47 = vadd.f32 %v1078_v29, %v1077_v48 }
 0x32e   :  { %1080 = vadd.xlane.f32.xlu1 %v1079_v47 }
 0x3b3   :  { %v1028_v26 = vpop.xlane.xlu0 %1027 }
 0x3b4   :  { %v1082_v30 = vmul.f32 0.001953125, %v1028_v26 }
 0x3b6   :  { %v1084_v7 = vmul.f32 %v1082_v30, %v1082_v30 }
 0x3b7   :  { %v1081_v5 = vpop.xlane.xlu1 %1080 }
 0x3b8   :  { %v1083_v50 = vmul.f32 0.001953125, %v1081_v5 }
 0x3ba   :  { %v1085_v46 = vsub.f32 %v1083_v50, %v1084_v7 }
 0x3bc   :  { %v1086_v40 = vadd.f32 1e-05, %v1085_v46 }
 0x3be   :  { %2420 = vrsqrt.f32 %v1086_v40 }
 0x3cb   :  { %v2421_v9 = vpop.eup %2420 }
 0x3cc   :  { %v1088_v60 = vmul.f32 %v3113_v49, %v2421_v9 }
 0x3ce   :  { %1097 = vperm.xlu1 %2397, %v1088_v60   ;;  %v1089_v41 = vmul.f32 %v1088_v60, %v1082_v30 }
 0x3d0   :  { %1091 = vrot.lane.b32.xlu0 %v1089_v41, %s2453_s19 }
 0x3d2   :  { %2400 = vset.pattern.permute.xlu1 %v2454_v44 }
 0x3d3   :  { %1624 = vperm.xlu1 %2400, %v3113_v49  }
 0x3d7   :  { %2401 = vset.pattern.permute.xlu1 %v2455_v39 }
 0x3d8   :  { %1684 = vperm.xlu1 %2401, %v3113_v49  }
 0x3dc   :  { %2403 = vset.pattern.permute.xlu1 %v2456_v32 }
 0x3dd   :  { %1790 = vperm.xlu1 %2403, %v3113_v49  }
 0x3e1   :  { %2404 = vset.pattern.permute.xlu1 %v2457_v25 }
 0x3e2   :  { %1801 = vperm.xlu1 %2404, %v3113_v49  }
 0x3e6   :  { %2406 = vset.pattern.permute.xlu1 %v2461_v52 }
 0x442   :  { %v1092_v36 = vpop.permute.xlu0 %1091 }
 0x443   :  { %v1094_v14 = vsub.f32 %v3113_v49, %v1092_v36 }
 0x445   :  { %1109 = vperm.xlu0 %2398, %v1094_v14  }
 0x449   :  { %2399 = vset.pattern.permute.xlu0 %v2458_v31  ;;  %v1098_v43 = vpop.permute.xlu1 %1097 }
 0x44a   :  { %1614 = vperm.xlu0 %2399, %v3113_v49   ;;  %v1100_v24 = vmul.f32 %v1098_v43, %v3152_v12  ;;  %v1101_v61 = vmul.f32 %v1098_v43, %v3172_v20  ;;  %v1102_v27 = vmul.f32 %v1098_v43, %v3169_v15  ;;  %v1104_v17 = vmul.f32 %v1098_v43, %v3198_v57 }
 0x44b   :  { %v1103_v59 = vmul.f32 %v1098_v43, %v3185_v34  ;;  %v1105_v12 = vmul.f32 %v1098_v43, %v3213_v37  ;;  %v1106_v39 = vmul.f32 %v1098_v43, %v3225_v0 }
 0x44e   :  { %2402 = vset.pattern.permute.xlu0 %v2459_v62 }
 0x44f   :  { %1702 = vperm.xlu0 %2402, %v3113_v49  }
 0x453   :  { %2405 = vset.pattern.permute.xlu0 %v2460_v53 }
 0x4c0   :  { %v1110_v63 = vpop.permute.xlu0 %1109 }
 0x4c1   :  { %v1114_v38 = vadd.f32 %v1110_v63, %v1102_v27  ;;  %v1112_v58 = vadd.f32 %v1110_v63, %v1100_v24  ;;  %v1116_v1 = vadd.f32 %v1110_v63, %v1104_v17  ;;  %v1113_v21 = vadd.f32 %v1110_v63, %v1101_v61  ;;  %v3330_v61 = vpop.permute.xlu1 %1624 }
 0x4c2   :  { %v1115_v3 = vadd.f32 %v1110_v63, %v1103_v59  ;;  %v1117_v57 = vadd.f32 %v1110_v63, %v1105_v12  ;;  %v1118_v36 = vadd.f32 %v1110_v63, %v1106_v39 }
 0x4c3   :  { %v1121_v55 = vmax.f32 %v1114_v38, 0.0  ;;  %v1119_v45 = vmax.f32 %v1112_v58, 0.0  ;;  %v1123_v6 = vmax.f32 %v1116_v1, 0.0  ;;  %v1120_v33 = vmax.f32 %v1113_v21, 0.0  ;;  %v3350_v21 = vld [vmem:[#allocation2 + $0x38] sm:$0xff] }
 0x4c4   :  { %v1122_v2 = vmax.f32 %v1115_v3, 0.0  ;;  %v1124_v47 = vmax.f32 %v1117_v57, 0.0  ;;  %v1125_v62 = vmax.f32 %v1118_v36, 0.0  ;;  %v2463_v58 = vmov 22   ;;  %v3352_v3 = vld [vmem:[#allocation3 + $0x38] sm:$0xff] }
 0x4c5   :  { %v1128_v20 = vmul.f32 %v1121_v55, %v3163_v28  ;;  %v1126_v15 = vmul.f32 %v1119_v45, %v3146_v51  ;;  %v1130_v54 = vmul.f32 %v1123_v6, %v3195_v42  ;;  %v1127_v48 = vmul.f32 %v1120_v33, %v3160_v56  ;;  %v3337_v63 = vpop.permute.xlu1 %1684  ;;  %v3361_v12 = vpop.permute.xlu0 %1614 }
 0x4c6   :  { %v1129_v29 = vmul.f32 %v1122_v2, %v3181_v10  ;;  %v1131_v30 = vmul.f32 %v1124_v47, %v3204_v13  ;;  %v1132_v52 = vmul.f32 %v1125_v62, %v3192_v35  ;;  %v2465_v45 = vmov 31  }
 0x4c7   :  { %v1144_v34 = vrot.slane %v1128_v20, %v2599_v4  ;;  %v1136_v23 = vrot.slane %v1126_v15, %v2599_v4  ;;  %v1152_v37 = vrot.slane %v1130_v54, %v2599_v4  ;;  %v1140_v18 = vrot.slane %v1127_v48, %v2599_v4 }
 0x4c8   :  { %v1203_v11 = vrot.slane %v1126_v15, %v2527_v16  ;;  %v1148_v26 = vrot.slane %v1129_v29, %v2599_v4  ;;  %v1211_v5 = vrot.slane %v1128_v20, %v2527_v16  ;;  %v1156_v7 = vrot.slane %v1131_v30, %v2599_v4 }
 0x4c9   :  { %1172 = vrot.lane.b32.xlu0 %v1144_v34, %s2449_s3  ;;  %1168 = vrot.lane.b32.xlu1 %v1136_v23, %s2449_s3  ;;  %v1219_v50 = vrot.slane %v1130_v54, %v2527_v16  ;;  %v1207_v46 = vrot.slane %v1127_v48, %v2527_v16  ;;  %v1270_v40 = vrot.slane %v1126_v15, %v2535_v19  ;;  %v3342_v38 = vpop.permute.xlu1 %1790  ;;  %v2466_v33 = vmov 24  }
 0x4ca   :  { %v1215_v8 = vrot.slane %v1129_v29, %v2527_v16  ;;  %v1278_v9 = vrot.slane %v1128_v20, %v2535_v19  ;;  %v1223_v60 = vrot.slane %v1131_v30, %v2527_v16  ;;  %v1286_v41 = vrot.slane %v1130_v54, %v2535_v19 }
 0x4cb   :  { %v1274_v44 = vrot.slane %v1127_v48, %v2535_v19  ;;  %v1337_v32 = vrot.slane %v1126_v15, %v2541_v22  ;;  %v1282_v25 = vrot.slane %v1129_v29, %v2535_v19  ;;  %v1345_v14 = vrot.slane %v1128_v20, %v2541_v22  ;;  %v3365_v15 = vpop.permute.xlu0 %1702 }
 0x4cc   :  { %v1290_v31 = vrot.slane %v1131_v30, %v2535_v19  ;;  %v1353_v0 = vrot.slane %v1130_v54, %v2541_v22  ;;  %v1341_v53 = vrot.slane %v1127_v48, %v2541_v22  ;;  %v1160_v43 = vrot.slane %v1132_v52, %v2599_v4 }
 0x4cd   :  { %1176 = vrot.lane.b32.xlu0 %v1152_v37, %s2449_s3  ;;  %1170 = vrot.lane.b32.xlu1 %v1140_v18, %s2449_s3  ;;  %v1349_v24 = vrot.slane %v1129_v29, %v2541_v22  ;;  %v1294_v27 = vrot.slane %v1132_v52, %v2535_v19  ;;  %v1357_v17 = vrot.slane %v1131_v30, %v2541_v22  ;;  %v2462_v4 = vmov 21   ;;  %v3348_v1 = vpop.permute.xlu1 %1801 }
 0x4ce   :  { %v1227_v59 = vrot.slane %v1132_v52, %v2527_v16  ;;  %v1361_v19 = vrot.slane %v1132_v52, %v2541_v22  ;;  %v2464_v16 = vmov 20   ;;  %v1799_v55 = vmul.f32 %v3342_v38, %v3350_v21 }
 0x4cf   :  { %v1810_v22 = vmul.f32 %v3348_v1, %v3352_v3  ;;  %v2467_v20 = vmov 25   ;;  %v2468_v2 = vmov 23   ;;  %v1693_v57 = vmul.f32 %v3337_v63, %v3350_v21 }
 0x4d0   :  { %v1711_v34 = vmul.f32 %v3365_v15, %v3352_v3  ;;  %v2469_v23 = vmov 30   ;;  %v2470_v48 = vmov 19   ;;  %v2471_v37 = vmov 18  }
 0x4d1   :  { %1235 = vrot.lane.b32.xlu0 %v1203_v11, %s2449_s3  ;;  %1174 = vrot.lane.b32.xlu1 %v1148_v26, %s2449_s3  ;;  %v1817_v6 = vadd.f32 %v1810_v22, %v1799_v55 }
 0x4d2   :  { %v1718_v54 = vadd.f32 %v1711_v34, %v1693_v57 }
 0x4d5   :  { %1239 = vrot.lane.b32.xlu0 %v1211_v5, %s2449_s3  ;;  %1178 = vrot.lane.b32.xlu1 %v1156_v7, %s2449_s3 }
 0x4d9   :  { %1243 = vrot.lane.b32.xlu0 %v1219_v50, %s2449_s3  ;;  %1237 = vrot.lane.b32.xlu1 %v1207_v46, %s2449_s3 }
 0x4dd   :  { %1302 = vrot.lane.b32.xlu0 %v1270_v40, %s2449_s3  ;;  %1241 = vrot.lane.b32.xlu1 %v1215_v8, %s2449_s3 }
 0x4e1   :  { %1306 = vrot.lane.b32.xlu0 %v1278_v9, %s2449_s3  ;;  %1245 = vrot.lane.b32.xlu1 %v1223_v60, %s2449_s3 }
 0x4e5   :  { %1310 = vrot.lane.b32.xlu0 %v1286_v41, %s2449_s3  ;;  %1304 = vrot.lane.b32.xlu1 %v1274_v44, %s2449_s3 }
 0x4e9   :  { %1369 = vrot.lane.b32.xlu0 %v1337_v32, %s2449_s3  ;;  %1308 = vrot.lane.b32.xlu1 %v1282_v25, %s2449_s3 }
 0x4ed   :  { %1373 = vrot.lane.b32.xlu0 %v1345_v14, %s2449_s3  ;;  %1312 = vrot.lane.b32.xlu1 %v1290_v31, %s2449_s3 }
 0x4f1   :  { %1377 = vrot.lane.b32.xlu0 %v1353_v0, %s2449_s3  ;;  %1371 = vrot.lane.b32.xlu1 %v1341_v53, %s2449_s3 }
 0x4f5   :  { %1180 = vrot.lane.b32.xlu0 %v1160_v43, %s2449_s3  ;;  %1375 = vrot.lane.b32.xlu1 %v1349_v24, %s2449_s3 }
 0x4f9   :  { %1314 = vrot.lane.b32.xlu0 %v1294_v27, %s2449_s3  ;;  %1379 = vrot.lane.b32.xlu1 %v1357_v17, %s2449_s3 }
 0x4fd   :  { %1860 = vperm.xlu0 %2405, %v3113_v49   ;;  %1247 = vrot.lane.b32.xlu1 %v1227_v59, %s2449_s3 }
 0x501   :  { %2408 = vset.pattern.permute.xlu0 %v2462_v4  ;;  %1871 = vperm.xlu1 %2406, %v3113_v49  }
 0x502   :  { %1456 = vperm.xlu0 %2408, %v3113_v49  }
 0x505   :  { %1381 = vrot.lane.b32.xlu1 %v1361_v19, %s2449_s3 }
 0x506   :  { %2411 = vset.pattern.permute.xlu0 %v2463_v58  ;;  %2407 = vset.pattern.permute.xlu1 %v2464_v16 }
 0x507   :  { %1515 = vperm.xlu0 %2411, %v3113_v49  }
 0x509   :  { %1445 = vperm.xlu1 %2407, %v3113_v49  }
 0x50b   :  { %2414 = vset.pattern.permute.xlu0 %v2465_v45 }
 0x50c   :  { %1772 = vperm.xlu0 %2414, %v3113_v49  }
 0x50d   :  { %2409 = vset.pattern.permute.xlu1 %v2466_v33 }
 0x50e   :  { %1585 = vperm.xlu1 %2409, %v3113_v49  }
 0x510   :  { %1837 = vrot.lane.b32.xlu0 %v1817_v6, %s2444_s27 }
 0x511   :  { %2416 = vset.pattern.permute.xlu0 %v2470_v48 }
 0x512   :  { %2410 = vset.pattern.permute.xlu1 %v2467_v20 }
 0x513   :  { %1596 = vperm.xlu1 %2410, %v3113_v49  }
 0x517   :  { %2412 = vset.pattern.permute.xlu1 %v2468_v2 }
 0x518   :  { %1526 = vperm.xlu1 %2412, %v3113_v49  }
 0x51c   :  { %2413 = vset.pattern.permute.xlu1 %v2469_v23 }
 0x51d   :  { %1761 = vperm.xlu1 %2413, %v3113_v49  }
 0x521   :  { %1738 = vrot.lane.b32.xlu1 %v1718_v54, %s2445_s28 }
 0x522   :  { %2415 = vset.pattern.permute.xlu1 %v2471_v37 }
 0x53b   :  { %v1169_v18 = vpop.permute.xlu1 %1168  ;;  %v1173_v29 = vpop.permute.xlu0 %1172 }
 0x53f   :  { %v1171_v47 = vpop.permute.xlu1 %1170  ;;  %v1177_v11 = vpop.permute.xlu0 %1176 }
 0x540   :  { %v1182_v26 = vsel %vm871_vm4, %v1169_v18, %v1171_v47  ;;  %v1183_v30 = vsel %vm871_vm4, %v1171_v47, %v1173_v29 }
 0x541   :  { %1194 = vst [vmem:[#allocation2] sm:$0xf] %v1182_v26  ;;  %1195 = vst [vmem:[#allocation2 + $0x18] sm:$0xf] %v1183_v30 }
 0x543   :  { %v1175_v5 = vpop.permute.xlu1 %1174  ;;  %v1236_v7 = vpop.permute.xlu0 %1235 }
 0x544   :  { %v1184_v49 = vsel %vm871_vm4, %v1173_v29, %v1175_v5  ;;  %v1185_v50 = vsel %vm871_vm4, %v1175_v5, %v1177_v11 }
 0x545   :  { %1196 = vst [vmem:[#allocation2 + $0x10] sm:$0xf] %v1184_v49  ;;  %1197 = vst [vmem:[#allocation2 + $0x8] sm:$0xf] %v1185_v50 }
 0x547   :  { %v1179_v46 = vpop.permute.xlu1 %1178  ;;  %v1240_v40 = vpop.permute.xlu0 %1239 }
 0x548   :  { %v1186_v8 = vsel %vm871_vm4, %v1177_v11, %v1179_v46 }
 0x549   :  { %1198 = vst [vmem:[#allocation2 + $0x20] sm:$0xf] %v1186_v8 }
 0x54b   :  { %v1238_v9 = vpop.permute.xlu1 %1237  ;;  %v1244_v60 = vpop.permute.xlu0 %1243 }
 0x54c   :  { %v1249_v41 = vsel %vm871_vm4, %v1236_v7, %v1238_v9  ;;  %v1250_v44 = vsel %vm871_vm4, %v1238_v9, %v1240_v40 }
 0x54d   :  { %1261 = vst [vmem:[#allocation2] sm:$0xf0] %v1249_v41  ;;  %1262 = vst [vmem:[#allocation2 + $0x18] sm:$0xf0] %v1250_v44 }
 0x54f   :  { %v1242_v39 = vpop.permute.xlu1 %1241  ;;  %v1303_v32 = vpop.permute.xlu0 %1302 }
 0x550   :  { %v1251_v25 = vsel %vm871_vm4, %v1240_v40, %v1242_v39  ;;  %v1252_v36 = vsel %vm871_vm4, %v1242_v39, %v1244_v60 }
 0x551   :  { %1263 = vst [vmem:[#allocation2 + $0x10] sm:$0xf0] %v1251_v25  ;;  %1264 = vst [vmem:[#allocation2 + $0x8] sm:$0xf0] %v1252_v36 }
 0x553   :  { %v1246_v14 = vpop.permute.xlu1 %1245  ;;  %v1307_v31 = vpop.permute.xlu0 %1306 }
 0x554   :  { %v1253_v62 = vsel %vm871_vm4, %v1244_v60, %v1246_v14  ;;  %v3394_v34 = vld [vmem:[#allocation2] sm:$0xff]  ;;  %v3408_v30 = vld [vmem:[#allocation2 + $0x18] sm:$0xff] }
 0x555   :  { %1265 = vst [vmem:[#allocation2 + $0x20] sm:$0xf0] %v1253_v62  ;;  %v1617_v47 = vmul.f32 %v3361_v12, %v3394_v34  ;;  %v1618_v60 = vmul.f32 %v3361_v12, %v3408_v30 }
 0x557   :  { %v1305_v0 = vpop.permute.xlu1 %1304  ;;  %v1311_v53 = vpop.permute.xlu0 %1310 }
 0x558   :  { %v1316_v52 = vsel %vm871_vm4, %v1303_v32, %v1305_v0  ;;  %v1317_v43 = vsel %vm871_vm4, %v1305_v0, %v1307_v31  ;;  %v3406_v26 = vld [vmem:[#allocation2 + $0x10] sm:$0xff]  ;;  %v3426_v44 = vld [vmem:[#allocation2 + $0x8] sm:$0xff] }
 0x559   :  { %1328 = vst [vmem:[#allocation3 + $0x18] sm:$0xf] %v1316_v52  ;;  %1329 = vst [vmem:[#allocation3 + $0x10] sm:$0xf] %v1317_v43  ;;  %v1619_v8 = vmul.f32 %v3361_v12, %v3406_v26  ;;  %v1620_v62 = vmul.f32 %v3361_v12, %v3426_v44  ;;  %v1687_v43 = vmul.f32 %v3337_v63, %v3394_v34 }
 0x55b   :  { %v1309_v24 = vpop.permute.xlu1 %1308  ;;  %v1370_v27 = vpop.permute.xlu0 %1369 }
 0x55c   :  { %v1318_v17 = vsel %vm871_vm4, %v1307_v31, %v1309_v24  ;;  %v1319_v59 = vsel %vm871_vm4, %v1309_v24, %v1311_v53  ;;  %v3424_v41 = vld [vmem:[#allocation2 + $0x20] sm:$0xff] }
 0x55d   :  { %1330 = vst [vmem:[#allocation3 + $0x20] sm:$0xf] %v1318_v17  ;;  %1331 = vst [vmem:[#allocation3 + $0x28] sm:$0xf] %v1319_v59  ;;  %v1689_v59 = vmul.f32 %v3337_v63, %v3406_v26 }
 0x55f   :  { %v1313_v4 = vpop.permute.xlu1 %1312  ;;  %v1374_v19 = vpop.permute.xlu0 %1373 }
 0x560   :  { %v1320_v58 = vsel %vm871_vm4, %v1311_v53, %v1313_v4 }
 0x561   :  { %1332 = vst [vmem:[#allocation3 + $0x8] sm:$0xf] %v1320_v58 }
 0x563   :  { %v1372_v16 = vpop.permute.xlu1 %1371  ;;  %v1378_v55 = vpop.permute.xlu0 %1377 }
 0x564   :  { %v1383_v22 = vsel %vm871_vm4, %v1370_v27, %v1372_v16  ;;  %v1384_v45 = vsel %vm871_vm4, %v1372_v16, %v1374_v19 }
 0x565   :  { %1395 = vst [vmem:[#allocation3 + $0x18] sm:$0xf0] %v1383_v22  ;;  %1396 = vst [vmem:[#allocation3 + $0x10] sm:$0xf0] %v1384_v45 }
 0x567   :  { %v1376_v6 = vpop.permute.xlu1 %1375  ;;  %v1181_v33 = vpop.permute.xlu0 %1180 }
 0x568   :  { %v1385_v20 = vsel %vm871_vm4, %v1374_v19, %v1376_v6  ;;  %v1386_v2 = vsel %vm871_vm4, %v1376_v6, %v1378_v55  ;;  %v1187_v57 = vsel %vm871_vm4, %v1179_v46, %v1181_v33  ;;  %v1794_v6 = vmul.f32 %v3342_v38, %v3408_v30 }
 0x569   :  { %1397 = vst [vmem:[#allocation3 + $0x20] sm:$0xf0] %v1385_v20  ;;  %1398 = vst [vmem:[#allocation3 + $0x28] sm:$0xf0] %v1386_v2 }
 0x56a   :  { %1199 = vst [vmem:[#allocation2 + $0x28] sm:$0xf] %v1187_v57  ;;  %v1796_v57 = vmul.f32 %v3342_v38, %v3426_v44 }
 0x56b   :  { %v1380_v23 = vpop.permute.xlu1 %1379  ;;  %v1315_v54 = vpop.permute.xlu0 %1314 }
 0x56c   :  { %v1387_v48 = vsel %vm871_vm4, %v1378_v55, %v1380_v23  ;;  %v1321_v37 = vsel %vm871_vm4, %v1313_v4, %v1315_v54  ;;  %v3398_v18 = vld [vmem:[#allocation3 + $0x18] sm:$0xff]  ;;  %v3400_v29 = vld [vmem:[#allocation3 + $0x10] sm:$0xff]  ;;  %v1691_v55 = vmul.f32 %v3337_v63, %v3424_v41 }
 0x56d   :  { %1399 = vst [vmem:[#allocation3 + $0x8] sm:$0xf0] %v1387_v48  ;;  %1333 = vst [vmem:[#allocation3 + $0x30] sm:$0xf] %v1321_v37  ;;  %v1627_v11 = vmul.f32 %v3330_v61, %v3398_v18  ;;  %v1628_v49 = vmul.f32 %v3330_v61, %v3400_v29  ;;  %v1705_v52 = vmul.f32 %v3365_v15, %v3398_v18 }
 0x56e   :  { %v1805_v45 = vmul.f32 %v3348_v1, %v3400_v29 }
 0x56f   :  { %v1248_v5 = vpop.permute.xlu1 %1247  ;;  %v1633_v7 = vadd.f32 %v1627_v11, %v1617_v47  ;;  %v1634_v32 = vadd.f32 %v1628_v49, %v1618_v60  ;;  %v1712_v24 = vadd.f32 %v1705_v52, %v1687_v43 }
 0x570   :  { %v1254_v50 = vsel %vm871_vm4, %v1246_v14, %v1248_v5  ;;  %v3413_v46 = vld [vmem:[#allocation3 + $0x20] sm:$0xff]  ;;  %v3415_v40 = vld [vmem:[#allocation3 + $0x28] sm:$0xff]  ;;  %v1621_v14 = vmul.f32 %v3361_v12, %v3424_v41  ;;  %v1812_v33 = vadd.f32 %v1805_v45, %v1794_v6  ;;  %v1706_v5 = vmul.f32 %v3365_v15, %v3400_v29 }
 0x571   :  { %1266 = vst [vmem:[#allocation2 + $0x28] sm:$0xf0] %v1254_v50  ;;  %1645 = vrot.lane.b32.xlu1 %v1633_v7, %s2444_s27  ;;  %v1629_v9 = vmul.f32 %v3330_v61, %v3413_v46  ;;  %v1630_v25 = vmul.f32 %v3330_v61, %v3415_v40  ;;  %v1707_v27 = vmul.f32 %v3365_v15, %v3413_v46 }
 0x572   :  { %v1807_v20 = vmul.f32 %v3348_v1, %v3415_v40  ;;  %v1708_v60 = vmul.f32 %v3365_v15, %v3415_v40  ;;  %v1797_v6 = vmul.f32 %v3342_v38, %v3424_v41 }
 0x573   :  { %v1635_v39 = vadd.f32 %v1629_v9, %v1619_v8  ;;  %v1636_v53 = vadd.f32 %v1630_v25, %v1620_v62  ;;  %v1714_v4 = vadd.f32 %v1707_v27, %v1689_v59 }
 0x574   :  { %v3430_v36 = vld [vmem:[#allocation3 + $0x8] sm:$0xff]  ;;  %v1814_v37 = vadd.f32 %v1807_v20, %v1796_v57  ;;  %v3539_v20 = vld [vmem:[#allocation3] sm:$0xff] }
 0x575   :  { %1649 = vrot.lane.b32.xlu0 %v1635_v39, %s2444_s27  ;;  %1647 = vrot.lane.b32.xlu1 %v1634_v32, %s2444_s27  ;;  %v1631_v31 = vmul.f32 %v3330_v61, %v3430_v36  ;;  %v1709_v19 = vmul.f32 %v3365_v15, %v3430_v36  ;;  %v1690_v32 = vmul.f32 %v3337_v63, %v3426_v44 }
 0x576   :  { %v1808_v45 = vmul.f32 %v3348_v1, %v3430_v36 }
 0x577   :  { %v1637_v0 = vadd.f32 %v1631_v31, %v1621_v14  ;;  %v1716_v22 = vadd.f32 %v1709_v19, %v1691_v55  ;;  %v1715_v62 = vadd.f32 %v1708_v60, %v1690_v32  ;;  %v1795_v19 = vmul.f32 %v3342_v38, %v3406_v26 }
 0x578   :  { %v3466_v2 = vld [vmem:[#allocation2 + $0x28] sm:$0xff]  ;;  %v3484_v49 = vpop.permute.xlu0 %1860 }
 0x579   :  { %1653 = vrot.lane.b32.xlu0 %v1637_v0, %s2444_s27  ;;  %1651 = vrot.lane.b32.xlu1 %v1636_v53, %s2444_s27  ;;  %v1622_v54 = vmul.f32 %v3361_v12, %v3466_v2  ;;  %v1692_v7 = vmul.f32 %v3337_v63, %v3466_v2  ;;  %v1863_v39 = vmul.f32 %v3484_v49, %v3394_v34 }
 0x57a   :  { %v1865_v0 = vmul.f32 %v3484_v49, %v3406_v26  ;;  %v1867_v27 = vmul.f32 %v3484_v49, %v3424_v41 }
 0x57c   :  { %v3448_v17 = vpop.permute.xlu1 %1871 }
 0x57d   :  { %1726 = vrot.lane.b32.xlu0 %v1712_v24, %s2445_s28  ;;  %v1874_v8 = vmul.f32 %v3448_v17, %v3398_v18  ;;  %v1876_v14 = vmul.f32 %v3448_v17, %v3413_v46  ;;  %v1878_v52 = vmul.f32 %v3448_v17, %v3430_v36  ;;  %v1806_v24 = vmul.f32 %v3348_v1, %v3413_v46  ;;  %v3520_v59 = vpop.permute.xlu0 %1456 }
 0x57e   :  { %v1880_v55 = vmul.f32 %v3448_v17, %v3352_v3  ;;  %v1461_v32 = vmul.f32 %v3520_v59, %v3400_v29 }
 0x57f   :  { %v1881_v25 = vadd.f32 %v1874_v8, %v1863_v39  ;;  %v1883_v53 = vadd.f32 %v1876_v14, %v1865_v0  ;;  %v1877_v39 = vmul.f32 %v3448_v17, %v3415_v40 }
 0x580   :  { %v1382_v58 = vpop.permute.xlu1 %1381 }
 0x581   :  { %v1388_v16 = vsel %vm871_vm4, %v1380_v23, %v1382_v58  ;;  %1730 = vrot.lane.b32.xlu0 %v1714_v4, %s2445_s28  ;;  %v1885_v58 = vadd.f32 %v1878_v52, %v1867_v27 }
 0x582   :  { %1400 = vst [vmem:[#allocation3 + $0x30] sm:$0xf0] %v1388_v16  ;;  %v1869_v16 = vmul.f32 %v3484_v49, %v3350_v21 }
 0x584   :  { %v3486_v50 = vpop.permute.xlu1 %1445  ;;  %v1887_v57 = vadd.f32 %v1880_v55, %v1869_v16 }
 0x585   :  { %1734 = vrot.lane.b32.xlu0 %v1716_v22, %s2445_s28  ;;  %v1813_v22 = vadd.f32 %v1806_v24, %v1795_v19  ;;  %v1459_v19 = vmul.f32 %v3520_v59, %v3539_v20 }
 0x589   :  { %1827 = vrot.lane.b32.xlu0 %v1812_v33, %s2444_s27  ;;  %v3471_v23 = vld [vmem:[#allocation3 + $0x30] sm:$0xff]  ;;  %v3503_v31 = vpop.permute.xlu1 %1585 }
 0x58a   :  { %v1632_v48 = vmul.f32 %v3330_v61, %v3471_v23  ;;  %v1710_v47 = vmul.f32 %v3365_v15, %v3471_v23  ;;  %v1688_v61 = vmul.f32 %v3337_v63, %v3408_v30  ;;  %v1804_v15 = vmul.f32 %v3348_v1, %v3398_v18  ;;  %v3537_v33 = vld [vmem:[#allocation2 + $0x30] sm:$0xff] }
 0x58b   :  { %v1793_v63 = vmul.f32 %v3342_v38, %v3394_v34  ;;  %v1879_v0 = vmul.f32 %v3448_v17, %v3471_v23  ;;  %v1448_v27 = vmul.f32 %v3486_v50, %v3537_v33 }
 0x58c   :  { %v1638_v11 = vadd.f32 %v1632_v48, %v1622_v54  ;;  %v1717_v12 = vadd.f32 %v1710_v47, %v1692_v7  ;;  %v1713_v9 = vadd.f32 %v1706_v5, %v1688_v61  ;;  %v3541_v54 = vpop.permute.xlu0 %1515  ;;  %v1809_v47 = vmul.f32 %v3348_v1, %v3471_v23  ;;  %v3560_v1 = vld [vmem:[%s3994_s1] sm:$0xff] }
 0x58d   :  { %1831 = vrot.lane.b32.xlu0 %v1814_v37, %s2444_s27  ;;  %v1811_v43 = vadd.f32 %v1804_v15, %v1793_v63  ;;  %v1815_v37 = vadd.f32 %v1808_v45, %v1797_v6  ;;  %v1798_v7 = vmul.f32 %v3342_v38, %v3466_v2  ;;  %v1450_v38 = vmul.f32 %v3486_v50, %v3408_v30 }
 0x58e   :  { %1655 = vrot.lane.b32.xlu1 %v1638_v11, %s2444_s27  ;;  %v3522_v4 = vpop.permute.xlu1 %1596  ;;  %v1518_v11 = vmul.f32 %v3541_v54, %v3537_v33  ;;  %v1463_v63 = vmul.f32 %v3520_v59, %v3415_v40  ;;  %v1522_v16 = vmul.f32 %v3541_v54, %v3426_v44  ;;  %v1466_v55 = vadd.f32 %v1459_v19, %v1448_v27 }
 0x58f   :  { %v1816_v61 = vadd.f32 %v1809_v47, %v1798_v7  ;;  %v1468_v14 = vadd.f32 %v1461_v32, %v1450_v38  ;;  %v1449_v6 = vmul.f32 %v3486_v50, %v3394_v34  ;;  %v1451_v7 = vmul.f32 %v3486_v50, %v3406_v26 }
 0x590   :  { %v1453_v38 = vmul.f32 %v3486_v50, %v3424_v41  ;;  %v1588_v27 = vmul.f32 %v3503_v31, %v3537_v33 }
 0x591   :  { %1736 = vrot.lane.b32.xlu0 %v1717_v12, %s2445_s28  ;;  %v1875_v12 = vmul.f32 %v3448_v17, %v3400_v29  ;;  %v1520_v17 = vmul.f32 %v3541_v54, %v3408_v30 }
 0x592   :  { %1728 = vrot.lane.b32.xlu1 %v1713_v9, %s2445_s28  ;;  %v1864_v9 = vmul.f32 %v3484_v49, %v3408_v30 }
 0x593   :  { %v3543_v48 = vpop.permute.xlu1 %1526 }
 0x594   :  { %v1529_v5 = vmul.f32 %v3543_v48, %v3539_v20  ;;  %v1882_v60 = vadd.f32 %v1875_v12, %v1864_v9  ;;  %v1534_v45 = vmul.f32 %v3543_v48, %v3430_v36  ;;  %v1462_v12 = vmul.f32 %v3520_v59, %v3413_v46 }
 0x595   :  { %1895 = vrot.lane.b32.xlu0 %v1881_v25, %s2445_s28  ;;  %v1866_v25 = vmul.f32 %v3484_v49, %v3426_v44  ;;  %v1530_v32 = vmul.f32 %v3543_v48, %v3398_v18 }
 0x596   :  { %1732 = vrot.lane.b32.xlu1 %v1715_v62, %s2445_s28  ;;  %v1536_v8 = vadd.f32 %v1529_v5, %v1518_v11  ;;  %v1452_v62 = vmul.f32 %v3486_v50, %v3426_v44  ;;  %v1535_v11 = vmul.f32 %v3543_v48, %v3471_v23  ;;  %v1469_v9 = vadd.f32 %v1462_v12, %v1451_v7 }
 0x597   :  { %v1884_v15 = vadd.f32 %v1877_v39, %v1866_v25  ;;  %v1519_v25 = vmul.f32 %v3541_v54, %v3394_v34  ;;  %v1594_v7 = vmul.f32 %v3503_v31, %v3466_v2 }
 0x598   :  { %v1470_v52 = vadd.f32 %v1463_v63, %v1452_v62  ;;  %v1532_v62 = vmul.f32 %v3543_v48, %v3413_v46  ;;  %v1465_v63 = vmul.f32 %v3520_v59, %v3471_v23 }
 0x599   :  { %1899 = vrot.lane.b32.xlu0 %v1883_v53, %s2445_s28  ;;  %v1868_v53 = vmul.f32 %v3484_v49, %v3466_v2  ;;  %v1533_v49 = vmul.f32 %v3543_v48, %v3415_v40 }
 0x59a   :  { %1825 = vrot.lane.b32.xlu1 %v1811_v43, %s2444_s27  ;;  %v1531_v43 = vmul.f32 %v3543_v48, %v3400_v29  ;;  %v3646_v48 = vpop.permute.xlu1 %1761 }
 0x59b   :  { %v1886_v24 = vadd.f32 %v1879_v0, %v1868_v53  ;;  %v1454_v53 = vmul.f32 %v3486_v50, %v3466_v2 }
 0x59d   :  { %1903 = vrot.lane.b32.xlu0 %v1885_v58, %s2445_s28  ;;  %v1538_v58 = vadd.f32 %v1531_v43, %v1520_v17  ;;  %v3644_v43 = vpop.permute.xlu0 %1772 }
 0x59e   :  { %1829 = vrot.lane.b32.xlu1 %v1813_v22, %s2444_s27  ;;  %v1540_v22 = vadd.f32 %v1533_v49, %v1522_v16  ;;  %v1739_v17 = vpop.permute.xlu1 %1738 }
 0x5a1   :  { %1907 = vrot.lane.b32.xlu0 %v1887_v57, %s2445_s28  ;;  %v1523_v57 = vmul.f32 %v3541_v54, %v3424_v41 }
 0x5a2   :  { %1833 = vrot.lane.b32.xlu1 %v1815_v37, %s2444_s27  ;;  %v1460_v37 = vmul.f32 %v3520_v59, %v3398_v18 }
 0x5a3   :  { %v1541_v47 = vadd.f32 %v1534_v45, %v1523_v57 }
 0x5a4   :  { %v1467_v5 = vadd.f32 %v1460_v37, %v1449_v6 }
 0x5a5   :  { %1427 = vperm.xlu0 %2416, %v3560_v1  }
 0x5a6   :  { %1835 = vrot.lane.b32.xlu1 %v1816_v61, %s2444_s27  ;;  %v1524_v61 = vmul.f32 %v3541_v54, %v3466_v2 }
 0x5a9   :  { %1550 = vrot.lane.b32.xlu0 %v1536_v8, %s2445_s28  ;;  %v1542_v8 = vadd.f32 %v1535_v11, %v1524_v61  ;;  %v1601_v11 = vmul.f32 %v3522_v4, %v3400_v29  ;;  %v1590_v61 = vmul.f32 %v3503_v31, %v3408_v30 }
 0x5aa   :  { %1897 = vrot.lane.b32.xlu1 %v1882_v60, %s2445_s28  ;;  %v1464_v60 = vmul.f32 %v3520_v59, %v3430_v36  ;;  %v1599_v59 = vmul.f32 %v3522_v4, %v3539_v20 }
 0x5ac   :  { %v1471_v39 = vadd.f32 %v1464_v60, %v1453_v38  ;;  %v1606_v50 = vadd.f32 %v1599_v59, %v1588_v27  ;;  %v1608_v60 = vadd.f32 %v1601_v11, %v1590_v61  ;;  %v1593_v11 = vmul.f32 %v3503_v31, %v3424_v41 }
 0x5ad   :  { %1484 = vrot.lane.b32.xlu0 %v1468_v14, %s2444_s27  ;;  %v1537_v14 = vadd.f32 %v1530_v32, %v1519_v25  ;;  %v1589_v32 = vmul.f32 %v3503_v31, %v3394_v34  ;;  %v1602_v25 = vmul.f32 %v3522_v4, %v3413_v46 }
 0x5ae   :  { %1901 = vrot.lane.b32.xlu1 %v1884_v15, %s2445_s28  ;;  %v1521_v15 = vmul.f32 %v3541_v54, %v3406_v26 }
 0x5b0   :  { %v1539_v0 = vadd.f32 %v1532_v62, %v1521_v15 }
 0x5b1   :  { %1488 = vrot.lane.b32.xlu0 %v1470_v52, %s2444_s27  ;;  %v1472_v52 = vadd.f32 %v1465_v63, %v1454_v53  ;;  %v1604_v53 = vmul.f32 %v3522_v4, %v3430_v36 }
 0x5b2   :  { %1905 = vrot.lane.b32.xlu1 %v1886_v24, %s2445_s28  ;;  %v3648_v24 = vpop.permute.xlu0 %1837 }
 0x5b5   :  { %1554 = vrot.lane.b32.xlu0 %v1538_v58, %s2445_s28 }
 0x5b6   :  { %1409 = vperm.xlu1 %2415, %v3560_v1  }
 0x5b9   :  { %1558 = vrot.lane.b32.xlu0 %v1540_v22, %s2445_s28 }
 0x5ba   :  { %1480 = vrot.lane.b32.xlu1 %v1466_v55, %s2444_s27 }
 0x5bd   :  { %1560 = vrot.lane.b32.xlu0 %v1541_v47, %s2445_s28  ;;  %v1605_v47 = vmul.f32 %v3522_v4, %v3471_v23 }
 0x5be   :  { %1482 = vrot.lane.b32.xlu1 %v1467_v5, %s2444_s27 }
 0x5bf   :  { %v1612_v38 = vadd.f32 %v1605_v47, %v1594_v7 }
 0x5c1   :  { %1562 = vrot.lane.b32.xlu0 %v1542_v8, %s2445_s28  ;;  %v1600_v8 = vmul.f32 %v3522_v4, %v3398_v18 }
 0x5c2   :  { %1486 = vrot.lane.b32.xlu1 %v1469_v9, %s2444_s27 }
 0x5c3   :  { %v1607_v59 = vadd.f32 %v1600_v8, %v1589_v32 }
 0x5c6   :  { %1490 = vrot.lane.b32.xlu1 %v1471_v39, %s2444_s27  ;;  %v1603_v39 = vmul.f32 %v3522_v4, %v3415_v40  ;;  %v1591_v4 = vmul.f32 %v3503_v31, %v3406_v26 }
 0x5ca   :  { %1552 = vrot.lane.b32.xlu1 %v1537_v14, %s2445_s28  ;;  %v1592_v14 = vmul.f32 %v3503_v31, %v3426_v44 }
 0x5cc   :  { %v1610_v47 = vadd.f32 %v1603_v39, %v1592_v14 }
 0x5ce   :  { %1556 = vrot.lane.b32.xlu1 %v1539_v0, %s2445_s28 }
 0x5d2   :  { %1492 = vrot.lane.b32.xlu1 %v1472_v52, %s2444_s27 }
 0x5e3   :  { %v1646_v19 = vpop.permute.xlu1 %1645 }
 0x5e4   :  { %v1669_v49 = vadd.f32 %v1646_v19, %v1606_v50 }
 0x5e7   :  { %v1650_v54 = vpop.permute.xlu0 %1649  ;;  %v1648_v45 = vpop.permute.xlu1 %1647 }
 0x5e8   :  { %v1658_v9 = vsel %vm329_vm0, %v1648_v45, %v1650_v54  ;;  %v1657_v0 = vsel %vm329_vm0, %v1646_v19, %v1648_v45 }
 0x5e9   :  { %v1671_v63 = vadd.f32 %v1658_v9, %v1608_v60  ;;  %v1670_v45 = vadd.f32 %v1657_v0, %v1607_v59  ;;  %v1611_v9 = vadd.f32 %v1604_v53, %v1593_v11  ;;  %v1609_v60 = vadd.f32 %v1602_v25, %v1591_v4 }
 0x5ea   :  { %v1775_v53 = vmul.f32 %v3644_v43, %v3398_v18  ;;  %v1767_v11 = vmul.f32 %v3646_v48, %v3426_v44 }
 0x5eb   :  { %v1654_v58 = vpop.permute.xlu0 %1653  ;;  %v1652_v37 = vpop.permute.xlu1 %1651 }
 0x5ec   :  { %v1660_v50 = vsel %vm329_vm0, %v1652_v37, %v1654_v58  ;;  %v1659_v61 = vsel %vm329_vm0, %v1650_v54, %v1652_v37 }
 0x5ed   :  { %v1673_v8 = vadd.f32 %v1660_v50, %v1610_v47  ;;  %v1672_v31 = vadd.f32 %v1659_v61, %v1609_v60 }
 0x5ef   :  { %v1727_v16 = vpop.permute.xlu0 %1726 }
 0x5f0   :  { %v1753_v55 = vadd.f32 %v1727_v16, %v1669_v49 }
 0x5f2   :  { %1936 = vrot.lane.b32.xlu1 %v1753_v55, %s2446_s29 }
 0x5f3   :  { %v1731_v22 = vpop.permute.xlu0 %1730 }
 0x5f7   :  { %v1735_v6 = vpop.permute.xlu0 %1734 }
 0x5fb   :  { %v3655_v57 = vpop.permute.xlu0 %1827 }
 0x5ff   :  { %v3661_v5 = vpop.permute.xlu0 %1831 }
 0x600   :  { %v1656_v12 = vpop.permute.xlu1 %1655 }
 0x601   :  { %v1675_v62 = vadd.f32 %v1656_v12, %v1612_v38 }
 0x603   :  { %v1737_v15 = vpop.permute.xlu0 %1736 }
 0x604   :  { %v1745_v52 = vsel %vm400_vm1, %v1737_v15, %v1739_v17  ;;  %v1729_v27 = vpop.permute.xlu1 %1728  ;;  %v1661_v17 = vsel %vm329_vm0, %v1654_v58, %v1656_v12  ;;  %v1744_v58 = vsel %vm400_vm1, %v1735_v6, %v1737_v15 }
 0x605   :  { %v1759_v49 = vadd.f32 %v1745_v52, %v1675_v62  ;;  %v1741_v55 = vsel %vm400_vm1, %v1729_v27, %v1731_v22  ;;  %v1740_v7 = vsel %vm400_vm1, %v1727_v16, %v1729_v27  ;;  %v1674_v32 = vadd.f32 %v1661_v17, %v1611_v9 }
 0x606   :  { %v1755_v19 = vadd.f32 %v1741_v55, %v1671_v63  ;;  %v1754_v39 = vadd.f32 %v1740_v7, %v1670_v45  ;;  %v1776_v52 = vmul.f32 %v3644_v43, %v3400_v29  ;;  %v1766_v55 = vmul.f32 %v3646_v48, %v3406_v26 }
 0x607   :  { %1948 = vrot.lane.b32.xlu0 %v1759_v49, %s2446_s29  ;;  %v1758_v37 = vadd.f32 %v1744_v58, %v1674_v32  ;;  %v1896_v0 = vpop.permute.xlu0 %1895  ;;  %v1777_v7 = vmul.f32 %v3644_v43, %v3413_v46  ;;  %v1768_v17 = vmul.f32 %v3646_v48, %v3424_v41  ;;  %v1779_v58 = vmul.f32 %v3644_v43, %v3430_v36 }
 0x608   :  { %v1733_v38 = vpop.permute.xlu1 %1732  ;;  %1940 = vrot.lane.b32.xlu1 %v1755_v19, %s2446_s29  ;;  %v1778_v19 = vmul.f32 %v3644_v43, %v3415_v40 }
 0x609   :  { %v1743_v16 = vsel %vm400_vm1, %v1733_v38, %v1735_v6  ;;  %v1742_v14 = vsel %vm400_vm1, %v1731_v22, %v1733_v38  ;;  %v1764_v22 = vmul.f32 %v3646_v48, %v3394_v34  ;;  %v1765_v6 = vmul.f32 %v3646_v48, %v3408_v30 }
 0x60a   :  { %v1757_v62 = vadd.f32 %v1743_v16, %v1673_v8  ;;  %v1756_v54 = vadd.f32 %v1742_v14, %v1672_v31  ;;  %v1784_v16 = vadd.f32 %v1777_v7, %v1766_v55  ;;  %v1785_v32 = vadd.f32 %v1778_v19, %v1767_v11 }
 0x60b   :  { %1938 = vrot.lane.b32.xlu0 %v1754_v39, %s2446_s29  ;;  %v1900_v15 = vpop.permute.xlu0 %1899  ;;  %v1782_v49 = vadd.f32 %v1775_v53, %v1764_v22  ;;  %v1783_v47 = vadd.f32 %v1776_v52, %v1765_v6  ;;  %v1781_v31 = vmul.f32 %v3644_v43, %v3352_v3 }
 0x60c   :  { %v1826_v12 = vpop.permute.xlu1 %1825  ;;  %1944 = vrot.lane.b32.xlu1 %v1757_v62, %s2446_s29 }
 0x60d   :  { %v1839_v59 = vsel %vm329_vm0, %v1826_v12, %v3655_v57  ;;  %v1780_v12 = vmul.f32 %v3644_v43, %v3471_v23  ;;  %v1786_v43 = vadd.f32 %v1779_v58, %v1768_v17 }
 0x60e   :  { %v1852_v45 = vadd.f32 %v1839_v59, %v1782_v49 }
 0x60f   :  { %1942 = vrot.lane.b32.xlu0 %v1756_v54, %s2446_s29  ;;  %v1904_v39 = vpop.permute.xlu0 %1903 }
 0x610   :  { %v1830_v25 = vpop.permute.xlu1 %1829  ;;  %1946 = vrot.lane.b32.xlu1 %v1758_v37, %s2446_s29 }
 0x611   :  { %v1840_v50 = vsel %vm329_vm0, %v3655_v57, %v1830_v25  ;;  %v1769_v57 = vmul.f32 %v3646_v48, %v3466_v2  ;;  %v1841_v8 = vsel %vm329_vm0, %v1830_v25, %v3661_v5 }
 0x612   :  { %v1853_v4 = vadd.f32 %v1840_v50, %v1783_v47  ;;  %v1854_v54 = vadd.f32 %v1841_v8, %v1784_v16 }
 0x613   :  { %v1787_v53 = vadd.f32 %v1780_v12, %v1769_v57  ;;  %v1908_v59 = vpop.permute.xlu0 %1907 }
 0x614   :  { %v1834_v63 = vpop.permute.xlu1 %1833 }
 0x615   :  { %v1842_v9 = vsel %vm329_vm0, %v3661_v5, %v1834_v63  ;;  %v1770_v5 = vmul.f32 %v3646_v48, %v3350_v21 }
 0x616   :  { %v1855_v37 = vadd.f32 %v1842_v9, %v1785_v32 }
 0x617   :  { %v1788_v48 = vadd.f32 %v1781_v31, %v1770_v5 }
 0x618   :  { %v1836_v27 = vpop.permute.xlu1 %1835 }
 0x619   :  { %v1844_v3 = vsel %vm329_vm0, %v1836_v27, %v3648_v24  ;;  %v1858_v7 = vadd.f32 %v3648_v24, %v1788_v48 }
 0x61a   :  { %v1857_v49 = vadd.f32 %v1844_v3, %v1787_v53 }
 0x61b   :  { %v1928_v19 = vadd.f32 %v1908_v59, %v1858_v7 }
 0x61c   :  { %v1898_v61 = vpop.permute.xlu1 %1897 }
 0x61d   :  { %v1909_v38 = vsel %vm400_vm1, %v1896_v0, %v1898_v61  ;;  %v1910_v60 = vsel %vm400_vm1, %v1898_v61, %v1900_v15  ;;  %v1843_v0 = vsel %vm329_vm0, %v1834_v63, %v1836_v27 }
 0x61e   :  { %v1922_v14 = vadd.f32 %v1909_v38, %v1852_v45  ;;  %v1923_v62 = vadd.f32 %v1910_v60, %v1853_v4  ;;  %v1856_v50 = vadd.f32 %v1843_v0, %v1786_v43 }
 0x620   :  { %v1902_v25 = vpop.permute.xlu1 %1901  ;;  %1977 = vrot.lane.b32.xlu0 %v1922_v14, %s2447_s30  ;;  %1979 = vrot.lane.b32.xlu1 %v1923_v62, %s2447_s30  ;;  %v1428_v4 = vpop.permute.xlu0 %1427 }
 0x621   :  { %v1911_v22 = vsel %vm400_vm1, %v1900_v15, %v1902_v25  ;;  %v1912_v6 = vsel %vm400_vm1, %v1902_v25, %v1904_v39  ;;  %v2472_v15 = vmov 39  }
 0x622   :  { %v1924_v52 = vadd.f32 %v1911_v22, %v1854_v54  ;;  %v1925_v21 = vadd.f32 %v1912_v6, %v1855_v37  ;;  %2417 = vset.pattern.permute.xlu1 %v2472_v15  ;;  %v1430_v37 = vmul.f32 %v1428_v4, %v3539_v20  ;;  %v1431_v22 = vmul.f32 %v1428_v4, %v3398_v18 }
 0x623   :  { %v1434_v20 = vmul.f32 %v1428_v4, %v3415_v40 }
 0x624   :  { %v1906_v55 = vpop.permute.xlu1 %1905  ;;  %1981 = vrot.lane.b32.xlu0 %v1924_v52, %s2447_s30  ;;  %1983 = vrot.lane.b32.xlu1 %v1925_v21, %s2447_s30  ;;  %v1551_v57 = vpop.permute.xlu0 %1550  ;;  %v1432_v52 = vmul.f32 %v1428_v4, %v3400_v29  ;;  %v1433_v21 = vmul.f32 %v1428_v4, %v3413_v46 }
 0x625   :  { %v1913_v63 = vsel %vm400_vm1, %v1904_v39, %v1906_v55  ;;  %v1914_v27 = vsel %vm400_vm1, %v1906_v55, %v1908_v59  ;;  %v1436_v55 = vmul.f32 %v1428_v4, %v3471_v23 }
 0x626   :  { %v1926_v47 = vadd.f32 %v1913_v63, %v1856_v50  ;;  %v1927_v11 = vadd.f32 %v1914_v27, %v1857_v49 }
 0x628   :  { %1985 = vrot.lane.b32.xlu1 %v1926_v47, %s2447_s30  ;;  %1987 = vrot.lane.b32.xlu0 %v1927_v11, %s2447_s30  ;;  %v1485_v8 = vpop.permute.xlu0 %1484 }
 0x62c   :  { %1989 = vrot.lane.b32.xlu1 %v1928_v19, %s2447_s30  ;;  %v1489_v38 = vpop.permute.xlu0 %1488 }
 0x630   :  { %v1555_v39 = vpop.permute.xlu0 %1554 }
 0x631   :  { %v1410_v45 = vpop.permute.xlu1 %1409 }
 0x632   :  { %v1412_v54 = vmul.f32 %v1410_v45, %v3537_v33  ;;  %v1413_v25 = vmul.f32 %v1410_v45, %v3394_v34  ;;  %v1414_v53 = vmul.f32 %v1410_v45, %v3408_v30  ;;  %v1415_v33 = vmul.f32 %v1410_v45, %v3406_v26 }
 0x633   :  { %v1435_v34 = vmul.f32 %v1428_v4, %v3430_v36  ;;  %v1416_v18 = vmul.f32 %v1410_v45, %v3426_v44  ;;  %v1417_v49 = vmul.f32 %v1410_v45, %v3424_v41  ;;  %v1418_v46 = vmul.f32 %v1410_v45, %v3466_v2 }
 0x634   :  { %v3753_v32 = vpop.permute.xlu0 %1558  ;;  %v1437_v6 = vadd.f32 %v1430_v37, %v1412_v54  ;;  %v1438_v59 = vadd.f32 %v1431_v22, %v1413_v25  ;;  %v1439_v26 = vadd.f32 %v1432_v52, %v1414_v53  ;;  %v1440_v7 = vadd.f32 %v1433_v21, %v1415_v33 }
 0x635   :  { %v1481_v17 = vpop.permute.xlu1 %1480  ;;  %v1441_v19 = vadd.f32 %v1434_v20, %v1416_v18  ;;  %v1442_v45 = vadd.f32 %v1435_v34, %v1417_v49 }
 0x638   :  { %v3755_v14 = vpop.permute.xlu0 %1560 }
 0x639   :  { %v1483_v61 = vpop.permute.xlu1 %1482 }
 0x63a   :  { %v1494_v43 = vsel %vm329_vm0, %v1481_v17, %v1483_v61  ;;  %v1495_v48 = vsel %vm329_vm0, %v1483_v61, %v1485_v8 }
 0x63b   :  { %v1507_v30 = vadd.f32 %v1494_v43, %v1437_v6  ;;  %v1508_v63 = vadd.f32 %v1495_v48, %v1438_v59  ;;  %v1443_v43 = vadd.f32 %v1436_v55, %v1418_v46 }
 0x63c   :  { %v3759_v31 = vpop.permute.xlu0 %1562 }
 0x63d   :  { %v1487_v9 = vpop.permute.xlu1 %1486 }
 0x63e   :  { %v1496_v40 = vsel %vm329_vm0, %v1485_v8, %v1487_v9  ;;  %v1497_v44 = vsel %vm329_vm0, %v1487_v9, %v1489_v38 }
 0x63f   :  { %v1509_v61 = vadd.f32 %v1496_v40, %v1439_v26  ;;  %v1510_v8 = vadd.f32 %v1497_v44, %v1440_v7 }
 0x641   :  { %v1491_v60 = vpop.permute.xlu1 %1490 }
 0x642   :  { %v1498_v47 = vsel %vm329_vm0, %v1489_v38, %v1491_v60 }
 0x643   :  { %v1511_v9 = vadd.f32 %v1498_v47, %v1441_v19 }
 0x645   :  { %v1553_v16 = vpop.permute.xlu1 %1552 }
 0x646   :  { %v1564_v50 = vsel %vm400_vm1, %v1551_v57, %v1553_v16  ;;  %v1565_v29 = vsel %vm400_vm1, %v1553_v16, %v1555_v39 }
 0x647   :  { %v1577_v41 = vadd.f32 %v1564_v50, %v1507_v30  ;;  %v1578_v2 = vadd.f32 %v1565_v29, %v1508_v63 }
 0x649   :  { %v1557_v24 = vpop.permute.xlu1 %1556 }
 0x64a   :  { %v1566_v23 = vsel %vm400_vm1, %v1555_v39, %v1557_v24  ;;  %v1567_v4 = vsel %vm400_vm1, %v1557_v24, %v3753_v32 }
 0x64b   :  { %v1580_v24 = vadd.f32 %v1567_v4, %v1510_v8 }
 0x64d   :  { %v3757_v62 = vpop.permute.xlu1 %1492 }
 0x64e   :  { %v1499_v17 = vsel %vm329_vm0, %v1491_v60, %v3757_v62  ;;  %v1568_v60 = vsel %vm400_vm1, %v3753_v32, %v3755_v14  ;;  %v1513_v18 = vadd.f32 %v3757_v62, %v1443_v43 }
 0x64f   :  { %v1512_v22 = vadd.f32 %v1499_v17, %v1442_v45  ;;  %v1581_v21 = vadd.f32 %v1568_v60, %v1511_v9 }
 0x650   :  { %v1583_v26 = vadd.f32 %v3759_v31, %v1513_v18 }
 0x664   :  { %v1937_v58 = vpop.permute.xlu1 %1936 }
 0x679   :  { %v3761_v12 = vpop.permute.xlu0 %1948 }
 0x67a   :  { %v1941_v5 = vpop.permute.xlu1 %1940 }
 0x67d   :  { %v1939_v0 = vpop.permute.xlu0 %1938 }
 0x67e   :  { %v1945_v3 = vpop.permute.xlu1 %1944  ;;  %v1950_v36 = vsel %vm787_vm2, %v1937_v58, %v1939_v0  ;;  %v1951_v11 = vsel %vm787_vm2, %v1939_v0, %v1941_v5  ;;  %v1579_v0 = vadd.f32 %v1566_v23, %v1509_v61 }
 0x67f   :  { %v1963_v57 = vadd.f32 %v1950_v36, %v1577_v41  ;;  %v1964_v38 = vadd.f32 %v1951_v11, %v1578_v2  ;;  %v1969_v36 = vadd.f32 %v3761_v12, %v1583_v26 }
 0x681   :  { %v1943_v27 = vpop.permute.xlu0 %1942 }
 0x682   :  { %v1947_v15 = vpop.permute.xlu1 %1946  ;;  %v1952_v54 = vsel %vm787_vm2, %v1941_v5, %v1943_v27  ;;  %v1953_v37 = vsel %vm787_vm2, %v1943_v27, %v1945_v3  ;;  %v1569_v5 = vsel %vm400_vm1, %v3755_v14, %v3759_v31 }
 0x683   :  { %v1965_v53 = vadd.f32 %v1952_v54, %v1579_v0  ;;  %v1966_v52 = vadd.f32 %v1953_v37, %v1580_v24  ;;  %v1954_v20 = vsel %vm787_vm2, %v1945_v3, %v1947_v15  ;;  %v1955_v32 = vsel %vm787_vm2, %v1947_v15, %v3761_v12 }
 0x684   :  { %v1582_v14 = vadd.f32 %v1569_v5, %v1512_v22  ;;  %v1967_v30 = vadd.f32 %v1954_v20, %v1581_v21 }
 0x686   :  { %v1968_v29 = vadd.f32 %v1955_v32, %v1582_v14 }
 0x692   :  { %v1980_v16 = vpop.permute.xlu1 %1979  ;;  %v1978_v58 = vpop.permute.xlu0 %1977 }
 0x693   :  { %v1991_v25 = vsel %vm829_vm3, %v1978_v58, %v1980_v16  ;;  %v3794_v39 = vadd.f32 %v1978_v58, %v1963_v57 }
 0x694   :  { %v3796_v6 = vadd.f32 %v1991_v25, %v1964_v38 }
 0x695   :  { %2018 = vrot.lane.b32.xlu0 %v3794_v39, %s2449_s3 }
 0x696   :  { %v1984_v48 = vpop.permute.xlu1 %1983  ;;  %2020 = vrot.lane.b32.xlu1 %v3796_v6, %s2449_s3  ;;  %v1982_v33 = vpop.permute.xlu0 %1981 }
 0x697   :  { %v1992_v34 = vsel %vm829_vm3, %v1980_v16, %v1982_v33  ;;  %v1993_v59 = vsel %vm829_vm3, %v1982_v33, %v1984_v48 }
 0x698   :  { %v2006_v50 = vadd.f32 %v1992_v34, %v1965_v53  ;;  %v3814_v49 = vadd.f32 %v1993_v59, %v1966_v52 }
 0x69a   :  { %v1986_v46 = vpop.permute.xlu1 %1985  ;;  %2024 = vrot.lane.b32.xlu1 %v3814_v49, %s2449_s3  ;;  %2022 = vrot.lane.b32.xlu0 %v2006_v50, %s2449_s3  ;;  %v1988_v3 = vpop.permute.xlu0 %1987 }
 0x69b   :  { %v1994_v55 = vsel %vm829_vm3, %v1984_v48, %v1986_v46  ;;  %v1995_v63 = vsel %vm829_vm3, %v1986_v46, %v1988_v3 }
 0x69c   :  { %v2008_v62 = vadd.f32 %v1994_v55, %v1967_v30  ;;  %v3822_v40 = vadd.f32 %v1995_v63, %v1968_v29 }
 0x69e   :  { %v1990_v27 = vpop.permute.xlu1 %1989  ;;  %2026 = vrot.lane.b32.xlu0 %v2008_v62, %s2449_s3  ;;  %2028 = vrot.lane.b32.xlu1 %v3822_v40, %s2449_s3 }
 0x69f   :  { %v1996_v15 = vsel %vm829_vm3, %v1988_v3, %v1990_v27 }
 0x6a0   :  { %v3829_v44 = vadd.f32 %v1996_v15, %v1969_v36 }
 0x6a2   :  { %2030 = vrot.lane.b32.xlu0 %v3829_v44, %s2449_s3  ;;  %2088 = vperm.xlu1 %2417, %v3560_v1  }
 0x707   :  { %v2019_v31 = vpop.permute.xlu0 %2018 }
 0x708   :  { %v2021_v47 = vpop.permute.xlu1 %2020 }
 0x709   :  { %v2032_v41 = vsel %vm871_vm4, %v2019_v31, %v2021_v47 }
 0x70a   :  { %v2044_v12 = vrot.slane %v2032_v41, 4 }
 0x70c   :  { %v2025_v11 = vpop.permute.xlu1 %2024  ;;  %2056 = vrot.lane.b32.xlu0 %v2044_v12, %s2450_s12  ;;  %v2023_v7 = vpop.permute.xlu0 %2022 }
 0x70d   :  { %v2033_v19 = vsel %vm871_vm4, %v2021_v47, %v2023_v7  ;;  %v2034_v2 = vsel %vm871_vm4, %v2023_v7, %v2025_v11 }
 0x70e   :  { %v2045_v45 = vrot.slane %v2033_v19, 4  ;;  %v2046_v23 = vrot.slane %v2034_v2, 4 }
 0x710   :  { %v2029_v4 = vpop.permute.xlu1 %2028  ;;  %2060 = vrot.lane.b32.xlu0 %v2046_v23, %s2450_s12  ;;  %2058 = vrot.lane.b32.xlu1 %v2045_v45, %s2450_s12  ;;  %v2027_v17 = vpop.permute.xlu0 %2026 }
 0x711   :  { %v2035_v57 = vsel %vm871_vm4, %v2025_v11, %v2027_v17  ;;  %v2036_v61 = vsel %vm871_vm4, %v2027_v17, %v2029_v4 }
 0x712   :  { %v2047_v8 = vrot.slane %v2035_v57, 4  ;;  %v2048_v9 = vrot.slane %v2036_v61, 4 }
 0x714   :  { %2064 = vrot.lane.b32.xlu0 %v2048_v9, %s2450_s12  ;;  %2062 = vrot.lane.b32.xlu1 %v2047_v8, %s2450_s12  ;;  %v2031_v38 = vpop.permute.xlu0 %2030 }
 0x715   :  { %v2037_v16 = vsel %vm871_vm4, %v2029_v4, %v2031_v38 }
 0x716   :  { %v2049_v58 = vrot.slane %v2037_v16, 4 }
 0x718   :  { %2066 = vrot.lane.b32.xlu1 %v2049_v58, %s2450_s12 }
 0x71d   :  { %v2089_v54 = vpop.permute.xlu1 %2088 }
 0x77e   :  { %v2057_v37 = vpop.permute.xlu0 %2056 }
 0x77f   :  { %v2080_v25 = vadd.f32 %v2057_v37, %v3794_v39 }
 0x781   :  { %v2091_v0 = vadd.f32 %v2089_v54, %v2080_v25 }
 0x782   :  { %v2059_v24 = vpop.permute.xlu1 %2058  ;;  %v2061_v22 = vpop.permute.xlu0 %2060 }
 0x783   :  { %v3848_v60 = vmul.f32 %v2091_v0, %v3146_v51  ;;  %v2068_v43 = vsel %vm908_vm5, %v2057_v37, %v2059_v24  ;;  %v2069_v5 = vsel %vm908_vm5, %v2059_v24, %v2061_v22 }
 0x784   :  { %v2081_v53 = vadd.f32 %v2068_v43, %v3796_v6  ;;  %v2082_v52 = vadd.f32 %v2069_v5, %v2006_v50 }
 0x785   :  { %2112 = vrot.lane.b32.xlu0 %v3848_v60, %s2449_s3 }
 0x786   :  { %v2092_v21 = vadd.f32 %v2089_v54, %v2081_v53  ;;  %v2093_v48 = vadd.f32 %v2089_v54, %v2082_v52  ;;  %v2063_v33 = vpop.permute.xlu1 %2062  ;;  %v2065_v39 = vpop.permute.xlu0 %2064 }
 0x787   :  { %v2070_v20 = vsel %vm908_vm5, %v2061_v22, %v2063_v33  ;;  %v2071_v32 = vsel %vm908_vm5, %v2063_v33, %v2065_v39 }
 0x788   :  { %v3858_v51 = vmul.f32 %v2092_v21, %v3160_v56  ;;  %v3861_v34 = vmul.f32 %v2093_v48, %v3163_v28  ;;  %v2083_v6 = vadd.f32 %v2070_v20, %v3814_v49  ;;  %v2084_v59 = vadd.f32 %v2071_v32, %v2008_v62 }
 0x789   :  { %v2151_v49 = vmul.f32 %v3848_v60, %v3848_v60 }
 0x78a   :  { %v2094_v18 = vadd.f32 %v2089_v54, %v2083_v6  ;;  %v2067_v14 = vpop.permute.xlu1 %2066  ;;  %2114 = vrot.lane.b32.xlu1 %v3858_v51, %s2449_s3  ;;  %2116 = vrot.lane.b32.xlu0 %v3861_v34, %s2449_s3  ;;  %v2095_v56 = vadd.f32 %v2089_v54, %v2084_v59  ;;  %v2153_v3 = vmul.f32 %v3861_v34, %v3861_v34 }
 0x78b   :  { %v2072_v50 = vsel %vm908_vm5, %v2065_v39, %v2067_v14  ;;  %v2152_v26 = vmul.f32 %v3858_v51, %v3858_v51 }
 0x78c   :  { %v3870_v30 = vmul.f32 %v2094_v18, %v3181_v10  ;;  %v2085_v28 = vadd.f32 %v2072_v50, %v3822_v40  ;;  %v3879_v29 = vmul.f32 %v2095_v56, %v3195_v42  ;;  %v2086_v10 = vadd.f32 %v2067_v14, %v3829_v44 }
 0x78e   :  { %2118 = vrot.lane.b32.xlu1 %v3870_v30, %s2449_s3  ;;  %2165 = vrot.lane.b32.xlu0 %v2151_v49, %s2449_s3  ;;  %v2096_v46 = vadd.f32 %v2089_v54, %v2085_v28  ;;  %v2154_v63 = vmul.f32 %v3870_v30, %v3870_v30  ;;  %v2097_v42 = vadd.f32 %v2089_v54, %v2086_v10 }
 0x78f   :  { %v2155_v62 = vmul.f32 %v3879_v29, %v3879_v29 }
 0x790   :  { %v3888_v55 = vmul.f32 %v2096_v46, %v3204_v13  ;;  %v3902_v13 = vmul.f32 %v2097_v42, %v3192_v35 }
 0x792   :  { %2169 = vrot.lane.b32.xlu0 %v2153_v3, %s2449_s3  ;;  %2120 = vrot.lane.b32.xlu1 %v3879_v29, %s2449_s3  ;;  %v2156_v40 = vmul.f32 %v3888_v55, %v3888_v55  ;;  %v2157_v36 = vmul.f32 %v3902_v13, %v3902_v13  ;;  %v2473_v3 = vmov 40  }
 0x793   :  { %2418 = vset.pattern.permute.xlu1 %v2473_v3 }
 0x796   :  { %2171 = vrot.lane.b32.xlu0 %v2154_v63, %s2449_s3  ;;  %2122 = vrot.lane.b32.xlu1 %v3888_v55, %s2449_s3 }
 0x79a   :  { %2167 = vrot.lane.b32.xlu1 %v2152_v26, %s2449_s3  ;;  %2173 = vrot.lane.b32.xlu0 %v2155_v62, %s2449_s3 }
 0x79e   :  { %2124 = vrot.lane.b32.xlu1 %v3902_v13, %s2449_s3  ;;  %2175 = vrot.lane.b32.xlu0 %v2156_v40, %s2449_s3 }
 0x7a2   :  { %2177 = vrot.lane.b32.xlu1 %v2157_v36, %s2449_s3 }
 0x7f7   :  { %v2113_v27 = vpop.permute.xlu0 %2112 }
 0x7fc   :  { %v2115_v15 = vpop.permute.xlu1 %2114  ;;  %v2117_v44 = vpop.permute.xlu0 %2116 }
 0x7fd   :  { %v2126_v12 = vsel %vm871_vm4, %v2113_v27, %v2115_v15  ;;  %v2127_v11 = vsel %vm871_vm4, %v2115_v15, %v2117_v44  ;;  %v2474_v27 = vmov 41  }
 0x7fe   :  { %v2138_v19 = vsel %vm1015_vm6, %v2126_v12, 0.0  ;;  %v2139_v2 = vsel %vm1015_vm6, %v2127_v11, 0.0  ;;  %2419 = vset.pattern.permute.xlu0 %v2474_v27  ;;  %v21_v12 = vld [vmem:[%s3995_s0 + $0x20] sm:$0xf]  ;;  %v23_v11 = vld [vmem:[%s3995_s0 + $0x30] sm:$0xf] }
 0x7ff   :  { %v2140_v57 = vadd.f32 %v2139_v2, %v2138_v19  ;;  %v22_v2 = vld [vmem:[%s3995_s0 + $0x28] sm:$0xf] }
 0x800   :  { %v2119_v31 = vpop.permute.xlu1 %2118  ;;  %v2166_v47 = vpop.permute.xlu0 %2165 }
 0x801   :  { %v2128_v7 = vsel %vm871_vm4, %v2117_v44, %v2119_v31 }
 0x802   :  { %v2141_v17 = vsel %vm1015_vm6, %v2128_v7, 0.0 }
 0x803   :  { %v2142_v16 = vadd.f32 %v2141_v17, %v2140_v57 }
 0x804   :  { %v2121_v35 = vpop.permute.xlu1 %2120  ;;  %v2170_v41 = vpop.permute.xlu0 %2169 }
 0x805   :  { %v2129_v4 = vsel %vm871_vm4, %v2119_v31, %v2121_v35 }
 0x806   :  { %v2143_v8 = vsel %vm1015_vm6, %v2129_v4, 0.0 }
 0x807   :  { %v2144_v22 = vadd.f32 %v2143_v8, %v2142_v16 }
 0x808   :  { %v2123_v45 = vpop.permute.xlu1 %2122  ;;  %v2172_v23 = vpop.permute.xlu0 %2171 }
 0x809   :  { %v2130_v61 = vsel %vm871_vm4, %v2121_v35, %v2123_v45  ;;  %v2181_v58 = vsel %vm871_vm4, %v2170_v41, %v2172_v23  ;;  %v20_v35 = vld [vmem:[%s3995_s0 + $0x18] sm:$0xf] }
 0x80a   :  { %v2145_v25 = vsel %vm1015_vm6, %v2130_v61, 0.0  ;;  %v2194_v53 = vsel %vm1015_vm6, %v2181_v58, 0.0 }
 0x80b   :  { %v2146_v48 = vadd.f32 %v2145_v25, %v2144_v22 }
 0x80c   :  { %v2168_v9 = vpop.permute.xlu1 %2167  ;;  %v2174_v38 = vpop.permute.xlu0 %2173 }
 0x80d   :  { %v2179_v54 = vsel %vm871_vm4, %v2166_v47, %v2168_v9  ;;  %v2180_v37 = vsel %vm871_vm4, %v2168_v9, %v2170_v41  ;;  %v2182_v5 = vsel %vm871_vm4, %v2172_v23, %v2174_v38  ;;  %v18_v47 = vld [vmem:[%s3995_s0 + $0x8] sm:$0xf]  ;;  %v19_v41 = vld [vmem:[%s3995_s0 + $0x10] sm:$0xf] }
 0x80e   :  { %v2191_v0 = vsel %vm1015_vm6, %v2179_v54, 0.0  ;;  %v2192_v24 = vsel %vm1015_vm6, %v2180_v37, 0.0  ;;  %v2196_v32 = vsel %vm1015_vm6, %v2182_v5, 0.0 }
 0x80f   :  { %v2193_v43 = vadd.f32 %v2192_v24, %v2191_v0 }
 0x810   :  { %v2125_v52 = vpop.permute.xlu1 %2124  ;;  %v2176_v21 = vpop.permute.xlu0 %2175 }
 0x811   :  { %v2195_v33 = vadd.f32 %v2194_v53, %v2193_v43  ;;  %v2131_v39 = vsel %vm871_vm4, %v2123_v45, %v2125_v52  ;;  %v2183_v20 = vsel %vm871_vm4, %v2174_v38, %v2176_v21 }
 0x812   :  { %v2147_v6 = vsel %vm1015_vm6, %v2131_v39, 0.0  ;;  %v2198_v14 = vsel %vm1015_vm6, %v2183_v20, 0.0 }
 0x813   :  { %v2197_v59 = vadd.f32 %v2196_v32, %v2195_v33  ;;  %v2148_v18 = vadd.f32 %v2147_v6, %v2146_v48 }
 0x814   :  { %v2178_v50 = vpop.permute.xlu1 %2177 }
 0x815   :  { %v2199_v56 = vadd.f32 %v2198_v14, %v2197_v59  ;;  %v2184_v28 = vsel %vm871_vm4, %v2176_v21, %v2178_v50  ;;  %2149 = vadd.xlane.f32.xlu0 %v2148_v18 }
 0x816   :  { %v2200_v49 = vsel %vm1015_vm6, %v2184_v28, 0.0 }
 0x817   :  { %v2201_v46 = vadd.f32 %v2200_v49, %v2199_v56 }
 0x819   :  { %2202 = vadd.xlane.f32.xlu1 %v2201_v46 }
 0x89e   :  { %v2150_v10 = vpop.xlane.xlu0 %2149 }
 0x89f   :  { %v2204_v63 = vmul.f32 0.001953125, %v2150_v10 }
 0x8a1   :  { %v2206_v26 = vmul.f32 %v2204_v63, %v2204_v63 }
 0x8a2   :  { %v2203_v42 = vpop.xlane.xlu1 %2202 }
 0x8a3   :  { %v2205_v62 = vmul.f32 0.001953125, %v2203_v42 }
 0x8a5   :  { %v2207_v40 = vsub.f32 %v2205_v62, %v2206_v26 }
 0x8a7   :  { %v2208_v36 = vadd.f32 1e-05, %v2207_v40 }
 0x8a9   :  { %2422 = vrsqrt.f32 %v2208_v36 }
 0x8b6   :  { %v2423_v15 = vpop.eup %2422 }
 0x8b7   :  { %v2210_v44 = vmul.f32 %v3560_v1, %v2423_v15 }
 0x8b9   :  { %2219 = vperm.xlu1 %2418, %v2210_v44   ;;  %v2211_v31 = vmul.f32 %v2210_v44, %v2204_v63 }
 0x8bb   :  { %2213 = vrot.lane.b32.xlu0 %v2211_v31, %s2453_s19 }
 0x8bd   :  { %2247 = vrot.lane.b32.xlu1 %v18_v47, %s2450_s12 }
 0x8bf   :  { %2251 = vrot.lane.b32.xlu0 %v20_v35, %s2450_s12 }
 0x8c1   :  { %2249 = vrot.lane.b32.xlu1 %v19_v41, %s2450_s12 }
 0x8c5   :  { %2253 = vrot.lane.b32.xlu1 %v21_v12, %s2450_s12 }
 0x8c9   :  { %2257 = vrot.lane.b32.xlu1 %v23_v11, %s2450_s12 }
 0x92d   :  { %v2214_v7 = vpop.permute.xlu0 %2213 }
 0x92e   :  { %v2216_v19 = vsub.f32 %v3560_v1, %v2214_v7 }
 0x930   :  { %2231 = vperm.xlu0 %2419, %v2216_v19  }
 0x931   :  { %v2252_v17 = vpop.permute.xlu0 %2251 }
 0x934   :  { %2255 = vrot.lane.b32.xlu0 %v22_v2, %s2450_s12  ;;  %v2220_v45 = vpop.permute.xlu1 %2219 }
 0x935   :  { %v2224_v57 = vmul.f32 %v2220_v45, %v3861_v34  ;;  %v2228_v9 = vmul.f32 %v2220_v45, %v3902_v13  ;;  %v2225_v38 = vmul.f32 %v2220_v45, %v3870_v30  ;;  %v2222_v1 = vmul.f32 %v2220_v45, %v3848_v60 }
 0x936   :  { %v2223_v16 = vmul.f32 %v2220_v45, %v3858_v51  ;;  %v2226_v54 = vmul.f32 %v2220_v45, %v3879_v29  ;;  %v2227_v37 = vmul.f32 %v2220_v45, %v3888_v55 }
 0x938   :  { %v2248_v23 = vpop.permute.xlu1 %2247 }
 0x93c   :  { %v2250_v4 = vpop.permute.xlu1 %2249 }
 0x93d   :  { %v2259_v58 = vsel %vm908_vm5, %v2248_v23, %v2250_v4  ;;  %v2260_v0 = vsel %vm908_vm5, %v2250_v4, %v2252_v17 }
 0x940   :  { %v2254_v61 = vpop.permute.xlu1 %2253 }
 0x941   :  { %v2261_v13 = vsel %vm908_vm5, %v2252_v17, %v2254_v61 }
 0x944   :  { %v2258_v60 = vpop.permute.xlu1 %2257 }
 0x9ab   :  { %v2232_v8 = vpop.permute.xlu0 %2231 }
 0x9ac   :  { %v2236_v25 = vadd.f32 %v2232_v8, %v2224_v57  ;;  %v2237_v34 = vadd.f32 %v2232_v8, %v2225_v38  ;;  %v2234_v24 = vadd.f32 %v2232_v8, %v2222_v1  ;;  %v2235_v22 = vadd.f32 %v2232_v8, %v2223_v16 }
 0x9ad   :  { %v2240_v43 = vadd.f32 %v2232_v8, %v2228_v9  ;;  %v2238_v30 = vadd.f32 %v2232_v8, %v2226_v54  ;;  %v2239_v53 = vadd.f32 %v2232_v8, %v2227_v37 }
 0x9ae   :  { %v2273_v5 = vadd.f32 %v2260_v0, %v2236_v25  ;;  %v2274_v52 = vadd.f32 %v2261_v13, %v2237_v34  ;;  %v2271_v21 = vadd.f32 %v2248_v23, %v2234_v24  ;;  %v2272_v48 = vadd.f32 %v2259_v58, %v2235_v22 }
 0x9af   :  { %v2256_v51 = vpop.permute.xlu0 %2255  ;;  %v2277_v18 = vadd.f32 %v2258_v60, %v2240_v43 }
 0x9b0   :  { %v2262_v29 = vsel %vm908_vm5, %v2254_v61, %v2256_v51  ;;  %v2263_v55 = vsel %vm908_vm5, %v2256_v51, %v2258_v60  ;;  %v2280_v33 = vmax.f32 %v2273_v5, 0.0  ;;  %v2281_v32 = vmax.f32 %v2274_v52, 0.0 }
 0x9b1   :  { %v2275_v39 = vadd.f32 %v2262_v29, %v2238_v30  ;;  %v2276_v20 = vadd.f32 %v2263_v55, %v2239_v53  ;;  %v2278_v6 = vmax.f32 %v2271_v21, 0.0  ;;  %v2279_v59 = vmax.f32 %v2272_v48, 0.0 }
 0x9b2   :  { %v2293_v56 = vcombine.low %v2280_v33, %v2281_v32  ;;  %v2284_v46 = vmax.f32 %v2277_v18, 0.0 }
 0x9b3   :  { %v2282_v14 = vmax.f32 %v2275_v39, 0.0  ;;  %v2283_v50 = vmax.f32 %v2276_v20, 0.0  ;;  %v2292_v28 = vcombine.low %v2278_v6, %v2279_v59 }
 0x9b4   :  { %2297 = vrot.lane.b32.xlu1 %v2293_v56, %s2449_s3 }
 0x9b5   :  { %v2294_v49 = vcombine.low %v2282_v14, %v2283_v50  ;;  %2295 = vrot.lane.b32.xlu0 %v2292_v28, %s2449_s3 }
 0x9b8   :  { %2301 = vrot.lane.b32.xlu1 %v2284_v46, %s2449_s3 }
 0x9b9   :  { %2299 = vrot.lane.b32.xlu0 %v2294_v49, %s2449_s3 }
 0xa26   :  { %v2298_v3 = vpop.permute.xlu1 %2297 }
 0xa27   :  { %v2304_v10 = vrot.slane %v2298_v3, 4  ;;  %v2296_v63 = vpop.permute.xlu0 %2295 }
 0xa28   :  { %v2303_v42 = vrot.slane %v2296_v63, 4 }
 0xa2a   :  { %v2307_v26 = vsel %vm1015_vm6, %v2303_v42, %v2304_v10  ;;  %v2302_v62 = vpop.permute.xlu1 %2301 }
 0xa2b   :  { %v2308_v40 = vsel %vm871_vm4, %v2296_v63, %v2307_v26  ;;  %v2306_v36 = vrot.slane %v2302_v62, 4  ;;  %v2300_v27 = vpop.permute.xlu0 %2299 }
 0xa2c   :  { %2316 = vst [vmem:[%s3996_s2] sm:$0xff] %v2308_v40  ;;  %v2305_v15 = vrot.slane %v2300_v27, 4 }
 0xa2e   :  { %v2309_v44 = vsel %vm1015_vm6, %v2304_v10, %v2305_v15  ;;  %v2311_v31 = vsel %vm1015_vm6, %v2305_v15, %v2306_v36 }
 0xa2f   :  { %v2310_v47 = vsel %vm871_vm4, %v2298_v3, %v2309_v44  ;;  %v2312_v35 = vsel %vm871_vm4, %v2300_v27, %v2311_v31 }
 0xa30   :  { %2317 = vst [vmem:[%s3996_s2 + $0x8] sm:$0xff] %v2310_v47  ;;  %2318 = vst [vmem:[%s3996_s2 + $0x10] sm:$0xff] %v2312_v35 }

</bundles_post_ra>
